<compile_context>
chip_gen: v7x
topology: tpu7x:2x2x1
jax: 0.10.0
libtpu: 0.0.40
codegen_flags: <defaults>
</compile_context>

<pallas_src>
import jax
import jax.numpy as jnp
from jax.experimental import pallas as pl
from jax.experimental.pallas import tpu as pltpu

BN_EPS = 1e-5
LANE = 128


def _round_up(n, m=LANE):
    return ((n + m - 1) // m) * m


def _vmem_limit_bytes():
    # Generation-aware cap: leave ~25% of physical VMEM as compiler headroom
    # (v7x has only 64 MiB per TensorCore; v5e/v6e have 128 MiB).
    try:
        cap = int(pltpu.get_tpu_info().vmem_capacity_bytes)
    except Exception:
        cap = 128 << 20
    return int(min(cap * 3 // 4, 96 << 20))


def _sage_relu_bn(x_bf16, adj_n, w_rel, w_root, b, gamma, beta):
    """DenseSAGEConv (normalize=False) -> ReLU -> BatchNorm1d (batch stats).

    x_bf16: (B,N,C) bf16, adj_n: (B,N,N) bf16 row-normalized adjacency,
    w_rel/w_root: (C, D) bf16, b/gamma/beta: (1,1,D) f32.  Returns f32 (B,N,D).
    """
    # Neighbor mean aggregation on the MXU (bf16 in, f32 accumulate); the
    # 1/deg scaling is already baked into adj_n.
    agg = jnp.einsum("bij,bjc->bic", adj_n, x_bf16,
                     preferred_element_type=jnp.float32)
    # rel + root matmuls as two MXU pushes accumulated in f32 (no concat copy).
    out = (jnp.einsum("bnc,cd->bnd", agg.astype(jnp.bfloat16), w_rel,
                      preferred_element_type=jnp.float32)
           + jnp.einsum("bnc,cd->bnd", x_bf16, w_root,
                        preferred_element_type=jnp.float32)
           + b)
    out = jnp.maximum(out, 0.0)  # F.relu(conv(...)) happens BEFORE bn

    # Single-pass BatchNorm1d statistics over the flattened (B*N, C) rows,
    # with the affine transform folded into one scale/shift pair.
    mean = jnp.mean(out, axis=(0, 1), keepdims=True)
    mean_sq = jnp.mean(out * out, axis=(0, 1), keepdims=True)
    var = jnp.maximum(mean_sq - mean * mean, 0.0)
    scale = gamma * jax.lax.rsqrt(var + BN_EPS)
    shift = beta - mean * scale
    return out * scale + shift


def gnn_kernel(
    x_ref, adj_ref,
    w1r_ref, w1o_ref, b1_ref, g1_ref, be1_ref,
    w2r_ref, w2o_ref, b2_ref, g2_ref, be2_ref,
    w3r_ref, w3o_ref, b3_ref, g3_ref, be3_ref,
    wl1_ref, wl2_ref, wl3_ref, bl_ref,
    out_ref,
):
    x0 = x_ref[...]                            # bf16 (B,N,Cin_p)
    adj_f32 = adj_ref[...].astype(jnp.float32)  # {0,1}: bf16 -> f32 exact

    # adj.sum(-1).clamp(min=1) reciprocal folded into the adjacency ONCE and
    # reused by all three conv layers.
    deg = jnp.sum(adj_f32, axis=-1, keepdims=True)
    deg_inv = pl.reciprocal(jnp.maximum(deg, 1.0), approx=True)
    adj_n = (adj_f32 * deg_inv).astype(jnp.bfloat16)

    x1 = _sage_relu_bn(x0, adj_n, w1r_ref[...], w1o_ref[...], b1_ref[...],
                       g1_ref[...], be1_ref[...])
    x1b = x1.astype(jnp.bfloat16)
    x2 = _sage_relu_bn(x1b, adj_n, w2r_ref[...], w2o_ref[...], b2_ref[...],
                       g2_ref[...], be2_ref[...])
    x2b = x2.astype(jnp.bfloat16)
    x3 = _sage_relu_bn(x2b, adj_n, w3r_ref[...], w3o_ref[...], b3_ref[...],
                       g3_ref[...], be3_ref[...])
    x3b = x3.astype(jnp.bfloat16)

    # Final Linear over cat([x1, x2, x3], -1) as three accumulated matmuls
    # (mathematically identical, avoids the (B,N,3C) concat buffer).
    y = (jnp.einsum("bnc,cd->bnd", x1b, wl1_ref[...],
                    preferred_element_type=jnp.float32)
         + jnp.einsum("bnc,cd->bnd", x2b, wl2_ref[...],
                      preferred_element_type=jnp.float32)
         + jnp.einsum("bnc,cd->bnd", x3b, wl3_ref[...],
                      preferred_element_type=jnp.float32)
         + bl_ref[...])
    out_ref[...] = jnp.maximum(y, 0.0)  # F.relu(self.lin(x))


def gnn_forward(x, adj, params):
    """params: dict of natural-shape weights; returns (B, N, out_channels) f32."""
    B, N, in_ch = x.shape
    hid_ch = params["w1_root"].shape[1]
    out_ch = params["w3_root"].shape[1]

    cin_p = _round_up(in_ch)
    hid_p = _round_up(hid_ch)
    out_p = _round_up(out_ch)

    f32, bf16 = jnp.float32, jnp.bfloat16

    def pad_w(w, rp, cp):
        return jnp.pad(
            w, ((0, rp - w.shape[0]), (0, cp - w.shape[1]))).astype(bf16)

    def pad_row(v, cp):
        v = v.reshape(1, 1, -1)
        return jnp.pad(v, ((0, 0), (0, 0), (0, cp - v.shape[-1]))).astype(f32)

    # Lane-dense, bf16 operands for the MXU.
    x_p = jnp.pad(x, ((0, 0), (0, 0), (0, cin_p - in_ch))).astype(bf16)
    adj_b = adj.astype(bf16)  # exact for {0,1}

    w1r = pad_w(params["w1_rel"], cin_p, hid_p)
    w1o = pad_w(params["w1_root"], cin_p, hid_p)
    w2r = pad_w(params["w2_rel"], hid_p, hid_p)
    w2o = pad_w(params["w2_root"], hid_p, hid_p)
    w3r = pad_w(params["w3_rel"], hid_p, out_p)
    w3o = pad_w(params["w3_root"], hid_p, out_p)
    wl1 = pad_w(params["wl1"], hid_p, out_p)
    wl2 = pad_w(params["wl2"], hid_p, out_p)
    wl3 = pad_w(params["wl3"], out_p, out_p)

    b1, g1, be1 = (pad_row(params["b1"], hid_p), pad_row(params["g1"], hid_p),
                   pad_row(params["be1"], hid_p))
    b2, g2, be2 = (pad_row(params["b2"], hid_p), pad_row(params["g2"], hid_p),
                   pad_row(params["be2"], hid_p))
    b3, g3, be3 = (pad_row(params["b3"], out_p), pad_row(params["g3"], out_p),
                   pad_row(params["be3"], out_p))
    bl = pad_row(params["bl"], out_p)

    args = (x_p, adj_b,
            w1r, w1o, b1, g1, be1,
            w2r, w2o, b2, g2, be2,
            w3r, w3o, b3, g3, be3,
            wl1, wl2, wl3, bl)

    # TODO(synk): a batch-parallel grid (2x on v7x's two TensorCores) is not
    # added because BatchNorm uses exact whole-batch statistics; doing so
    # requires a cross-grid-step stats reduction or a per-layer two-pass split.
    vmem_spec = pl.BlockSpec(memory_space=pltpu.MemorySpace.VMEM)
    out_padded = pl.pallas_call(
        gnn_kernel,
        out_shape=jax.ShapeDtypeStruct((B, N, out_p), jnp.float32),
        in_specs=[vmem_spec] * len(args),
        out_specs=vmem_spec,
        compiler_params=pltpu.CompilerParams(
            vmem_limit_bytes=_vmem_limit_bytes()),
    )(*args)
    return out_padded[:, :, :out_ch]


def init_params(key, in_ch, hid_ch, out_ch):
    ks = jax.random.split(key, 16)
    f32 = jnp.float32

    def w(k, i, o, scale=0.1):
        return (scale * jax.random.normal(k, (i, o))).astype(f32)

    def row(k, c, scale=0.1):
        return (scale * jax.random.normal(k, (1, 1, c))).astype(f32)

    p = {
        # conv1: DenseSAGEConv(in_ch -> hid_ch): lin_rel (no bias), lin_root (+bias)
        "w1_rel": w(ks[0], in_ch, hid_ch), "w1_root": w(ks[1], in_ch, hid_ch),
        "b1": row(ks[2], hid_ch),
        "g1": jnp.ones((1, 1, hid_ch), f32), "be1": jnp.zeros((1, 1, hid_ch), f32),
        # conv2: hid -> hid
        "w2_rel": w(ks[3], hid_ch, hid_ch), "w2_root": w(ks[4], hid_ch, hid_ch),
        "b2": row(ks[5], hid_ch),
        "g2": jnp.ones((1, 1, hid_ch), f32), "be2": jnp.zeros((1, 1, hid_ch), f32),
        # conv3: hid -> out
        "w3_rel": w(ks[6], hid_ch, out_ch), "w3_root": w(ks[7], hid_ch, out_ch),
        "b3": row(ks[8], out_ch),
        "g3": jnp.ones((1, 1, out_ch), f32), "be3": jnp.zeros((1, 1, out_ch), f32),
        # lin: Linear(2*hid + out -> out), split along the concat axis
        "wl1": w(ks[9], hid_ch, out_ch),
        "wl2": w(ks[10], hid_ch, out_ch),
        "wl3": w(ks[11], out_ch, out_ch),
        "bl": row(ks[12], out_ch),
    }
    return p


if __name__ == "__main__":
    # TODO(synk): optional `mask` argument of the reference forward is not wired
    # in (call site uses mask=None); adding it is a per-node multiply post-conv.
    B, N = 2, 16
    in_ch, hid_ch, out_ch = 4, 32, 16

    key = jax.random.PRNGKey(0)
    kx, ka, kp = jax.random.split(key, 3)

    x = jax.random.normal(kx, (B, N, in_ch), dtype=jnp.float32)
    # symmetric {0,1} adjacency with self-loops, deterministic
    a = (jax.random.uniform(ka, (B, N, N)) > 0.6).astype(jnp.float32)
    adj = jnp.clip(a + jnp.transpose(a, (0, 2, 1)) + jnp.eye(N)[None], 0.0, 1.0)

    params = init_params(kp, in_ch, hid_ch, out_ch)

    out = gnn_forward(x, adj, params)
    jax.block_until_ready(out)
    assert out.shape == (B, N, out_ch) and out.dtype == jnp.float32
    print("KERNEL_OK")
</pallas_src>

<mosaic_0001>
module attributes {stable_mosaic.version = 11 : i64} {
  func.func @gnn_kernel(%arg0: memref<2x16x128xbf16, #tpu.memory_space<vmem>>, %arg1: memref<2x16x16xbf16, #tpu.memory_space<vmem>>, %arg2: memref<128x128xbf16, #tpu.memory_space<vmem>>, %arg3: memref<128x128xbf16, #tpu.memory_space<vmem>>, %arg4: memref<1x1x128xf32, #tpu.memory_space<vmem>>, %arg5: memref<1x1x128xf32, #tpu.memory_space<vmem>>, %arg6: memref<1x1x128xf32, #tpu.memory_space<vmem>>, %arg7: memref<128x128xbf16, #tpu.memory_space<vmem>>, %arg8: memref<128x128xbf16, #tpu.memory_space<vmem>>, %arg9: memref<1x1x128xf32, #tpu.memory_space<vmem>>, %arg10: memref<1x1x128xf32, #tpu.memory_space<vmem>>, %arg11: memref<1x1x128xf32, #tpu.memory_space<vmem>>, %arg12: memref<128x128xbf16, #tpu.memory_space<vmem>>, %arg13: memref<128x128xbf16, #tpu.memory_space<vmem>>, %arg14: memref<1x1x128xf32, #tpu.memory_space<vmem>>, %arg15: memref<1x1x128xf32, #tpu.memory_space<vmem>>, %arg16: memref<1x1x128xf32, #tpu.memory_space<vmem>>, %arg17: memref<128x128xbf16, #tpu.memory_space<vmem>>, %arg18: memref<128x128xbf16, #tpu.memory_space<vmem>>, %arg19: memref<128x128xbf16, #tpu.memory_space<vmem>>, %arg20: memref<1x1x128xf32, #tpu.memory_space<vmem>>, %arg21: memref<2x16x128xf32, #tpu.memory_space<vmem>>) attributes {dimension_semantics = [], scalar_prefetch = 0 : i64, scratch_operands = 0 : i64, tpu.core_type = #tpu.core_type<tc>} {
    %c0 = arith.constant 0 : index
    %c0_0 = arith.constant 0 : index
    %c0_1 = arith.constant 0 : index
    %0 = vector.load %arg0[%c0, %c0_0, %c0_1] : memref<2x16x128xbf16, #tpu.memory_space<vmem>>, vector<2x16x128xbf16>
    %c0_2 = arith.constant 0 : index
    %c0_3 = arith.constant 0 : index
    %c0_4 = arith.constant 0 : index
    %1 = vector.load %arg1[%c0_2, %c0_3, %c0_4] : memref<2x16x16xbf16, #tpu.memory_space<vmem>>, vector<2x16x16xbf16>
    %2 = arith.extf %1 : vector<2x16x16xbf16> to vector<2x16x16xf32>
    %cst = arith.constant dense<0.000000e+00> : vector<2x16xf32>
    %3 = vector.multi_reduction <add>, %2, %cst [2] : vector<2x16x16xf32> to vector<2x16xf32>
    %4 = vector.shape_cast %3 : vector<2x16xf32> to vector<2x16x1xf32>
    %cst_5 = arith.constant 1.000000e+00 : f32
    %5 = vector.broadcast %cst_5 : f32 to vector<2x16x1xf32>
    %6 = arith.maximumf %4, %5 : vector<2x16x1xf32>
    %7 = tpu.reciprocal %6 {approx = true} : vector<2x16x1xf32> -> vector<2x16x1xf32>
    %8 = vector.broadcast %7 : vector<2x16x1xf32> to vector<2x16x16xf32>
    %9 = arith.mulf %2, %8 : vector<2x16x16xf32>
    %10 = arith.truncf %9 : vector<2x16x16xf32> to vector<2x16x16xbf16>
    %c0_6 = arith.constant 0 : index
    %c0_7 = arith.constant 0 : index
    %11 = vector.load %arg2[%c0_6, %c0_7] : memref<128x128xbf16, #tpu.memory_space<vmem>>, vector<128x128xbf16>
    %c0_8 = arith.constant 0 : index
    %c0_9 = arith.constant 0 : index
    %12 = vector.load %arg3[%c0_8, %c0_9] : memref<128x128xbf16, #tpu.memory_space<vmem>>, vector<128x128xbf16>
    %c0_10 = arith.constant 0 : index
    %c0_11 = arith.constant 0 : index
    %c0_12 = arith.constant 0 : index
    %13 = vector.load %arg4[%c0_10, %c0_11, %c0_12] : memref<1x1x128xf32, #tpu.memory_space<vmem>>, vector<1x1x128xf32>
    %c0_13 = arith.constant 0 : index
    %c0_14 = arith.constant 0 : index
    %c0_15 = arith.constant 0 : index
    %14 = vector.load %arg5[%c0_13, %c0_14, %c0_15] : memref<1x1x128xf32, #tpu.memory_space<vmem>>, vector<1x1x128xf32>
    %c0_16 = arith.constant 0 : index
    %c0_17 = arith.constant 0 : index
    %c0_18 = arith.constant 0 : index
    %15 = vector.load %arg6[%c0_16, %c0_17, %c0_18] : memref<1x1x128xf32, #tpu.memory_space<vmem>>, vector<1x1x128xf32>
    "tpu.trace_start"() <{level = 10 : i32, message = "bij,bjc->bic"}> : () -> ()
    %cst_19 = arith.constant dense<0.000000e+00> : vector<2x16x128xf32>
    %16 = tpu.matmul %10, %0, %cst_19 {dimension_numbers = #tpu.dot_dimension_numbers<[2], [1], [1], [2], [0, 0, 0, 1, 1, 2], [0], [0]>} : vector<2x16x16xbf16>, vector<2x16x128xbf16>, vector<2x16x128xf32> -> vector<2x16x128xf32>
    "tpu.trace_stop"() : () -> ()
    %17 = arith.truncf %16 : vector<2x16x128xf32> to vector<2x16x128xbf16>
    "tpu.trace_start"() <{level = 10 : i32, message = "bnc,cd->bnd"}> : () -> ()
    %cst_20 = arith.constant dense<0.000000e+00> : vector<2x16x128xf32>
    %18 = tpu.matmul %17, %11, %cst_20 {dimension_numbers = #tpu.dot_dimension_numbers<[2], [0], [0, 1], [1], [0, 0, 0, 1, 1, 1], [], []>} : vector<2x16x128xbf16>, vector<128x128xbf16>, vector<2x16x128xf32> -> vector<2x16x128xf32>
    %cst_21 = arith.constant dense<0.000000e+00> : vector<2x16x128xf32>
    %19 = tpu.matmul %0, %12, %cst_21 {dimension_numbers = #tpu.dot_dimension_numbers<[2], [0], [0, 1], [1], [0, 0, 0, 1, 1, 1], [], []>} : vector<2x16x128xbf16>, vector<128x128xbf16>, vector<2x16x128xf32> -> vector<2x16x128xf32>
    "tpu.trace_stop"() : () -> ()
    %20 = arith.addf %18, %19 : vector<2x16x128xf32>
    %21 = vector.broadcast %13 : vector<1x1x128xf32> to vector<2x16x128xf32>
    %22 = arith.addf %20, %21 : vector<2x16x128xf32>
    %cst_22 = arith.constant 0.000000e+00 : f32
    %23 = vector.broadcast %cst_22 : f32 to vector<2x16x128xf32>
    %24 = arith.maximumf %22, %23 : vector<2x16x128xf32>
    %cst_23 = arith.constant dense<0.000000e+00> : vector<128xf32>
    %25 = vector.multi_reduction <add>, %24, %cst_23 [0, 1] : vector<2x16x128xf32> to vector<128xf32>
    %26 = vector.shape_cast %25 : vector<128xf32> to vector<1x1x128xf32>
    %cst_24 = arith.constant 3.200000e+01 : f32
    %27 = vector.broadcast %cst_24 : f32 to vector<1x1x128xf32>
    %28 = arith.divf %26, %27 : vector<1x1x128xf32>
    %29 = arith.mulf %24, %24 : vector<2x16x128xf32>
    %cst_25 = arith.constant dense<0.000000e+00> : vector<128xf32>
    %30 = vector.multi_reduction <add>, %29, %cst_25 [0, 1] : vector<2x16x128xf32> to vector<128xf32>
    %31 = vector.shape_cast %30 : vector<128xf32> to vector<1x1x128xf32>
    %cst_26 = arith.constant 3.200000e+01 : f32
    %32 = vector.broadcast %cst_26 : f32 to vector<1x1x128xf32>
    %33 = arith.divf %31, %32 : vector<1x1x128xf32>
    %34 = arith.mulf %28, %28 : vector<1x1x128xf32>
    %35 = arith.subf %33, %34 : vector<1x1x128xf32>
    %cst_27 = arith.constant 0.000000e+00 : f32
    %36 = vector.broadcast %cst_27 : f32 to vector<1x1x128xf32>
    %37 = arith.maximumf %35, %36 : vector<1x1x128xf32>
    %cst_28 = arith.constant 9.99999974E-6 : f32
    %38 = vector.broadcast %cst_28 : f32 to vector<1x1x128xf32>
    %39 = arith.addf %37, %38 : vector<1x1x128xf32>
    %40 = math.rsqrt %39 : vector<1x1x128xf32>
    %41 = arith.mulf %14, %40 : vector<1x1x128xf32>
    %42 = arith.mulf %28, %41 : vector<1x1x128xf32>
    %43 = arith.subf %15, %42 : vector<1x1x128xf32>
    %44 = vector.broadcast %41 : vector<1x1x128xf32> to vector<2x16x128xf32>
    %45 = arith.mulf %24, %44 : vector<2x16x128xf32>
    %46 = vector.broadcast %43 : vector<1x1x128xf32> to vector<2x16x128xf32>
    %47 = arith.addf %45, %46 : vector<2x16x128xf32>
    %48 = arith.truncf %47 : vector<2x16x128xf32> to vector<2x16x128xbf16>
    %c0_29 = arith.constant 0 : index
    %c0_30 = arith.constant 0 : index
    %49 = vector.load %arg7[%c0_29, %c0_30] : memref<128x128xbf16, #tpu.memory_space<vmem>>, vector<128x128xbf16>
    %c0_31 = arith.constant 0 : index
    %c0_32 = arith.constant 0 : index
    %50 = vector.load %arg8[%c0_31, %c0_32] : memref<128x128xbf16, #tpu.memory_space<vmem>>, vector<128x128xbf16>
    %c0_33 = arith.constant 0 : index
    %c0_34 = arith.constant 0 : index
    %c0_35 = arith.constant 0 : index
    %51 = vector.load %arg9[%c0_33, %c0_34, %c0_35] : memref<1x1x128xf32, #tpu.memory_space<vmem>>, vector<1x1x128xf32>
    %c0_36 = arith.constant 0 : index
    %c0_37 = arith.constant 0 : index
    %c0_38 = arith.constant 0 : index
    %52 = vector.load %arg10[%c0_36, %c0_37, %c0_38] : memref<1x1x128xf32, #tpu.memory_space<vmem>>, vector<1x1x128xf32>
    %c0_39 = arith.constant 0 : index
    %c0_40 = arith.constant 0 : index
    %c0_41 = arith.constant 0 : index
    %53 = vector.load %arg11[%c0_39, %c0_40, %c0_41] : memref<1x1x128xf32, #tpu.memory_space<vmem>>, vector<1x1x128xf32>
    "tpu.trace_start"() <{level = 10 : i32, message = "bij,bjc->bic"}> : () -> ()
    %cst_42 = arith.constant dense<0.000000e+00> : vector<2x16x128xf32>
    %54 = tpu.matmul %10, %48, %cst_42 {dimension_numbers = #tpu.dot_dimension_numbers<[2], [1], [1], [2], [0, 0, 0, 1, 1, 2], [0], [0]>} : vector<2x16x16xbf16>, vector<2x16x128xbf16>, vector<2x16x128xf32> -> vector<2x16x128xf32>
    "tpu.trace_stop"() : () -> ()
    %55 = arith.truncf %54 : vector<2x16x128xf32> to vector<2x16x128xbf16>
    "tpu.trace_start"() <{level = 10 : i32, message = "bnc,cd->bnd"}> : () -> ()
    %cst_43 = arith.constant dense<0.000000e+00> : vector<2x16x128xf32>
    %56 = tpu.matmul %55, %49, %cst_43 {dimension_numbers = #tpu.dot_dimension_numbers<[2], [0], [0, 1], [1], [0, 0, 0, 1, 1, 1], [], []>} : vector<2x16x128xbf16>, vector<128x128xbf16>, vector<2x16x128xf32> -> vector<2x16x128xf32>
    %cst_44 = arith.constant dense<0.000000e+00> : vector<2x16x128xf32>
    %57 = tpu.matmul %48, %50, %cst_44 {dimension_numbers = #tpu.dot_dimension_numbers<[2], [0], [0, 1], [1], [0, 0, 0, 1, 1, 1], [], []>} : vector<2x16x128xbf16>, vector<128x128xbf16>, vector<2x16x128xf32> -> vector<2x16x128xf32>
    "tpu.trace_stop"() : () -> ()
    %58 = arith.addf %56, %57 : vector<2x16x128xf32>
    %59 = vector.broadcast %51 : vector<1x1x128xf32> to vector<2x16x128xf32>
    %60 = arith.addf %58, %59 : vector<2x16x128xf32>
    %cst_45 = arith.constant 0.000000e+00 : f32
    %61 = vector.broadcast %cst_45 : f32 to vector<2x16x128xf32>
    %62 = arith.maximumf %60, %61 : vector<2x16x128xf32>
    %cst_46 = arith.constant dense<0.000000e+00> : vector<128xf32>
    %63 = vector.multi_reduction <add>, %62, %cst_46 [0, 1] : vector<2x16x128xf32> to vector<128xf32>
    %64 = vector.shape_cast %63 : vector<128xf32> to vector<1x1x128xf32>
    %cst_47 = arith.constant 3.200000e+01 : f32
    %65 = vector.broadcast %cst_47 : f32 to vector<1x1x128xf32>
    %66 = arith.divf %64, %65 : vector<1x1x128xf32>
    %67 = arith.mulf %62, %62 : vector<2x16x128xf32>
    %cst_48 = arith.constant dense<0.000000e+00> : vector<128xf32>
    %68 = vector.multi_reduction <add>, %67, %cst_48 [0, 1] : vector<2x16x128xf32> to vector<128xf32>
    %69 = vector.shape_cast %68 : vector<128xf32> to vector<1x1x128xf32>
    %cst_49 = arith.constant 3.200000e+01 : f32
    %70 = vector.broadcast %cst_49 : f32 to vector<1x1x128xf32>
    %71 = arith.divf %69, %70 : vector<1x1x128xf32>
    %72 = arith.mulf %66, %66 : vector<1x1x128xf32>
    %73 = arith.subf %71, %72 : vector<1x1x128xf32>
    %cst_50 = arith.constant 0.000000e+00 : f32
    %74 = vector.broadcast %cst_50 : f32 to vector<1x1x128xf32>
    %75 = arith.maximumf %73, %74 : vector<1x1x128xf32>
    %cst_51 = arith.constant 9.99999974E-6 : f32
    %76 = vector.broadcast %cst_51 : f32 to vector<1x1x128xf32>
    %77 = arith.addf %75, %76 : vector<1x1x128xf32>
    %78 = math.rsqrt %77 : vector<1x1x128xf32>
    %79 = arith.mulf %52, %78 : vector<1x1x128xf32>
    %80 = arith.mulf %66, %79 : vector<1x1x128xf32>
    %81 = arith.subf %53, %80 : vector<1x1x128xf32>
    %82 = vector.broadcast %79 : vector<1x1x128xf32> to vector<2x16x128xf32>
    %83 = arith.mulf %62, %82 : vector<2x16x128xf32>
    %84 = vector.broadcast %81 : vector<1x1x128xf32> to vector<2x16x128xf32>
    %85 = arith.addf %83, %84 : vector<2x16x128xf32>
    %86 = arith.truncf %85 : vector<2x16x128xf32> to vector<2x16x128xbf16>
    %c0_52 = arith.constant 0 : index
    %c0_53 = arith.constant 0 : index
    %87 = vector.load %arg12[%c0_52, %c0_53] : memref<128x128xbf16, #tpu.memory_space<vmem>>, vector<128x128xbf16>
    %c0_54 = arith.constant 0 : index
    %c0_55 = arith.constant 0 : index
    %88 = vector.load %arg13[%c0_54, %c0_55] : memref<128x128xbf16, #tpu.memory_space<vmem>>, vector<128x128xbf16>
    %c0_56 = arith.constant 0 : index
    %c0_57 = arith.constant 0 : index
    %c0_58 = arith.constant 0 : index
    %89 = vector.load %arg14[%c0_56, %c0_57, %c0_58] : memref<1x1x128xf32, #tpu.memory_space<vmem>>, vector<1x1x128xf32>
    %c0_59 = arith.constant 0 : index
    %c0_60 = arith.constant 0 : index
    %c0_61 = arith.constant 0 : index
    %90 = vector.load %arg15[%c0_59, %c0_60, %c0_61] : memref<1x1x128xf32, #tpu.memory_space<vmem>>, vector<1x1x128xf32>
    %c0_62 = arith.constant 0 : index
    %c0_63 = arith.constant 0 : index
    %c0_64 = arith.constant 0 : index
    %91 = vector.load %arg16[%c0_62, %c0_63, %c0_64] : memref<1x1x128xf32, #tpu.memory_space<vmem>>, vector<1x1x128xf32>
    "tpu.trace_start"() <{level = 10 : i32, message = "bij,bjc->bic"}> : () -> ()
    %cst_65 = arith.constant dense<0.000000e+00> : vector<2x16x128xf32>
    %92 = tpu.matmul %10, %86, %cst_65 {dimension_numbers = #tpu.dot_dimension_numbers<[2], [1], [1], [2], [0, 0, 0, 1, 1, 2], [0], [0]>} : vector<2x16x16xbf16>, vector<2x16x128xbf16>, vector<2x16x128xf32> -> vector<2x16x128xf32>
    "tpu.trace_stop"() : () -> ()
    %93 = arith.truncf %92 : vector<2x16x128xf32> to vector<2x16x128xbf16>
    "tpu.trace_start"() <{level = 10 : i32, message = "bnc,cd->bnd"}> : () -> ()
    %cst_66 = arith.constant dense<0.000000e+00> : vector<2x16x128xf32>
    %94 = tpu.matmul %93, %87, %cst_66 {dimension_numbers = #tpu.dot_dimension_numbers<[2], [0], [0, 1], [1], [0, 0, 0, 1, 1, 1], [], []>} : vector<2x16x128xbf16>, vector<128x128xbf16>, vector<2x16x128xf32> -> vector<2x16x128xf32>
    %cst_67 = arith.constant dense<0.000000e+00> : vector<2x16x128xf32>
    %95 = tpu.matmul %86, %88, %cst_67 {dimension_numbers = #tpu.dot_dimension_numbers<[2], [0], [0, 1], [1], [0, 0, 0, 1, 1, 1], [], []>} : vector<2x16x128xbf16>, vector<128x128xbf16>, vector<2x16x128xf32> -> vector<2x16x128xf32>
    "tpu.trace_stop"() : () -> ()
    %96 = arith.addf %94, %95 : vector<2x16x128xf32>
    %97 = vector.broadcast %89 : vector<1x1x128xf32> to vector<2x16x128xf32>
    %98 = arith.addf %96, %97 : vector<2x16x128xf32>
    %cst_68 = arith.constant 0.000000e+00 : f32
    %99 = vector.broadcast %cst_68 : f32 to vector<2x16x128xf32>
    %100 = arith.maximumf %98, %99 : vector<2x16x128xf32>
    %cst_69 = arith.constant dense<0.000000e+00> : vector<128xf32>
    %101 = vector.multi_reduction <add>, %100, %cst_69 [0, 1] : vector<2x16x128xf32> to vector<128xf32>
    %102 = vector.shape_cast %101 : vector<128xf32> to vector<1x1x128xf32>
    %cst_70 = arith.constant 3.200000e+01 : f32
    %103 = vector.broadcast %cst_70 : f32 to vector<1x1x128xf32>
    %104 = arith.divf %102, %103 : vector<1x1x128xf32>
    %105 = arith.mulf %100, %100 : vector<2x16x128xf32>
    %cst_71 = arith.constant dense<0.000000e+00> : vector<128xf32>
    %106 = vector.multi_reduction <add>, %105, %cst_71 [0, 1] : vector<2x16x128xf32> to vector<128xf32>
    %107 = vector.shape_cast %106 : vector<128xf32> to vector<1x1x128xf32>
    %cst_72 = arith.constant 3.200000e+01 : f32
    %108 = vector.broadcast %cst_72 : f32 to vector<1x1x128xf32>
    %109 = arith.divf %107, %108 : vector<1x1x128xf32>
    %110 = arith.mulf %104, %104 : vector<1x1x128xf32>
    %111 = arith.subf %109, %110 : vector<1x1x128xf32>
    %cst_73 = arith.constant 0.000000e+00 : f32
    %112 = vector.broadcast %cst_73 : f32 to vector<1x1x128xf32>
    %113 = arith.maximumf %111, %112 : vector<1x1x128xf32>
    %cst_74 = arith.constant 9.99999974E-6 : f32
    %114 = vector.broadcast %cst_74 : f32 to vector<1x1x128xf32>
    %115 = arith.addf %113, %114 : vector<1x1x128xf32>
    %116 = math.rsqrt %115 : vector<1x1x128xf32>
    %117 = arith.mulf %90, %116 : vector<1x1x128xf32>
    %118 = arith.mulf %104, %117 : vector<1x1x128xf32>
    %119 = arith.subf %91, %118 : vector<1x1x128xf32>
    %120 = vector.broadcast %117 : vector<1x1x128xf32> to vector<2x16x128xf32>
    %121 = arith.mulf %100, %120 : vector<2x16x128xf32>
    %122 = vector.broadcast %119 : vector<1x1x128xf32> to vector<2x16x128xf32>
    %123 = arith.addf %121, %122 : vector<2x16x128xf32>
    %124 = arith.truncf %123 : vector<2x16x128xf32> to vector<2x16x128xbf16>
    %c0_75 = arith.constant 0 : index
    %c0_76 = arith.constant 0 : index
    %125 = vector.load %arg17[%c0_75, %c0_76] : memref<128x128xbf16, #tpu.memory_space<vmem>>, vector<128x128xbf16>
    "tpu.trace_start"() <{level = 10 : i32, message = "bnc,cd->bnd"}> : () -> ()
    %cst_77 = arith.constant dense<0.000000e+00> : vector<2x16x128xf32>
    %126 = tpu.matmul %48, %125, %cst_77 {dimension_numbers = #tpu.dot_dimension_numbers<[2], [0], [0, 1], [1], [0, 0, 0, 1, 1, 1], [], []>} : vector<2x16x128xbf16>, vector<128x128xbf16>, vector<2x16x128xf32> -> vector<2x16x128xf32>
    "tpu.trace_stop"() : () -> ()
    %c0_78 = arith.constant 0 : index
    %c0_79 = arith.constant 0 : index
    %127 = vector.load %arg18[%c0_78, %c0_79] : memref<128x128xbf16, #tpu.memory_space<vmem>>, vector<128x128xbf16>
    "tpu.trace_start"() <{level = 10 : i32, message = "bnc,cd->bnd"}> : () -> ()
    %cst_80 = arith.constant dense<0.000000e+00> : vector<2x16x128xf32>
    %128 = tpu.matmul %86, %127, %cst_80 {dimension_numbers = #tpu.dot_dimension_numbers<[2], [0], [0, 1], [1], [0, 0, 0, 1, 1, 1], [], []>} : vector<2x16x128xbf16>, vector<128x128xbf16>, vector<2x16x128xf32> -> vector<2x16x128xf32>
    "tpu.trace_stop"() : () -> ()
    %129 = arith.addf %126, %128 : vector<2x16x128xf32>
    %c0_81 = arith.constant 0 : index
    %c0_82 = arith.constant 0 : index
    %130 = vector.load %arg19[%c0_81, %c0_82] : memref<128x128xbf16, #tpu.memory_space<vmem>>, vector<128x128xbf16>
    "tpu.trace_start"() <{level = 10 : i32, message = "bnc,cd->bnd"}> : () -> ()
    %cst_83 = arith.constant dense<0.000000e+00> : vector<2x16x128xf32>
    %131 = tpu.matmul %124, %130, %cst_83 {dimension_numbers = #tpu.dot_dimension_numbers<[2], [0], [0, 1], [1], [0, 0, 0, 1, 1, 1], [], []>} : vector<2x16x128xbf16>, vector<128x128xbf16>, vector<2x16x128xf32> -> vector<2x16x128xf32>
    "tpu.trace_stop"() : () -> ()
    %132 = arith.addf %129, %131 : vector<2x16x128xf32>
    %c0_84 = arith.constant 0 : index
    %c0_85 = arith.constant 0 : index
    %c0_86 = arith.constant 0 : index
    %133 = vector.load %arg20[%c0_84, %c0_85, %c0_86] : memref<1x1x128xf32, #tpu.memory_space<vmem>>, vector<1x1x128xf32>
    %134 = vector.broadcast %133 : vector<1x1x128xf32> to vector<2x16x128xf32>
    %135 = arith.addf %132, %134 : vector<2x16x128xf32>
    %cst_87 = arith.constant 0.000000e+00 : f32
    %136 = vector.broadcast %cst_87 : f32 to vector<2x16x128xf32>
    %137 = arith.maximumf %135, %136 : vector<2x16x128xf32>
    %c0_88 = arith.constant 0 : index
    %c0_89 = arith.constant 0 : index
    %c0_90 = arith.constant 0 : index
    %138 = vector.load %arg21[%c0_88, %c0_89, %c0_90] : memref<2x16x128xf32, #tpu.memory_space<vmem>>, vector<2x16x128xf32>
    tpu.vector_store %arg21[%c0_88, %c0_89, %c0_90], %137 {strides = array<i32>} : memref<2x16x128xf32, #tpu.memory_space<vmem>>, vector<2x16x128xf32>,
    return
  }
}

</mosaic_0001>

<bundles_post_ra>
// kernel: tpu_custom_call.1
= control target key start
LH: loop header
LB: loop body
LE: loop exit
PB: predicated region body
PF: predicated region fallthrough
CT: control target
= control target key end

     0   :  { %s3509_s0 = inlined_call_operand.hbm [shape: bf16[2,16,128], index: 0, kind: input, shape index: {}]   ;;  %s3510_s1 = inlined_call_operand.hbm [shape: bf16[2,16,16], index: 1, kind: input, shape index: {}]   ;;  %s3511_s2 = inlined_call_operand.hbm [shape: bf16[128,128], index: 2, kind: input, shape index: {}]   ;;  %s3512_s3 = inlined_call_operand.hbm [shape: bf16[128,128], index: 3, kind: input, shape index: {}]   ;;  %s3513_s4 = inlined_call_operand.hbm [shape: f32[1,1,128], index: 4, kind: input, shape index: {}]   ;;  %s3514_s5 = inlined_call_operand.hbm [shape: f32[1,1,128], index: 5, kind: input, shape index: {}]   ;;  %s3515_s6 = inlined_call_operand.hbm [shape: f32[1,1,128], index: 6, kind: input, shape index: {}]   ;;  %s3516_s7 = inlined_call_operand.hbm [shape: bf16[128,128], index: 7, kind: input, shape index: {}]   ;;  %s3517_s8 = inlined_call_operand.hbm [shape: bf16[128,128], index: 8, kind: input, shape index: {}]   ;;  %s3518_s9 = inlined_call_operand.hbm [shape: f32[1,1,128], index: 9, kind: input, shape index: {}]   ;;  %s3519_s10 = inlined_call_operand.hbm [shape: f32[1,1,128], index: 10, kind: input, shape index: {}]   ;;  %s3520_s11 = inlined_call_operand.hbm [shape: f32[1,1,128], index: 11, kind: input, shape index: {}]   ;;  %s3521_s12 = inlined_call_operand.hbm [shape: bf16[128,128], index: 12, kind: input, shape index: {}]   ;;  %s3522_s13 = inlined_call_operand.hbm [shape: bf16[128,128], index: 13, kind: input, shape index: {}]   ;;  %s3523_s14 = inlined_call_operand.hbm [shape: f32[1,1,128], index: 14, kind: input, shape index: {}]   ;;  %s3524_s15 = inlined_call_operand.hbm [shape: f32[1,1,128], index: 15, kind: input, shape index: {}]   ;;  %s3525_s16 = inlined_call_operand.hbm [shape: f32[1,1,128], index: 16, kind: input, shape index: {}]   ;;  %s3526_s17 = inlined_call_operand.hbm [shape: bf16[128,128], index: 17, kind: input, shape index: {}]   ;;  %s3527_s18 = inlined_call_operand.hbm [shape: bf16[128,128], index: 18, kind: input, shape index: {}]   ;;  %s3528_s19 = inlined_call_operand.hbm [shape: bf16[128,128], index: 19, kind: input, shape index: {}]   ;;  %s3529_s20 = inlined_call_operand.hbm [shape: f32[1,1,128], index: 20, kind: input, shape index: {}]   ;;  %s3530_s21 = inlined_call_operand.hbm [shape: f32[2,16,128], index: 21, kind: output, shape index: {}]  }
   0x1   :  { %3540 = sst [smem:[#allocation48_spill]] %s3509_s0 }
   0x2   :  { %3541 = sst [smem:[#allocation49_spill]] %s3510_s1 }
   0x3   :  { %3542 = sst [smem:[#allocation50_spill]] %s3511_s2 }
   0x4   :  { %3543 = sst [smem:[#allocation51_spill]] %s3512_s3 }
   0x5   :  { %3544 = sst [smem:[#allocation52_spill]] %s3513_s4 }
   0x6   :  { %3545 = sst [smem:[#allocation53_spill]] %s3514_s5 }
   0x7   :  { %3546 = sst [smem:[#allocation54_spill]] %s3527_s18 }
   0x8   :  { %3547 = sst [smem:[#allocation55_spill]] %s3529_s20 }
   0x9   :  { %3548 = sst [smem:[#allocation56_spill]] %s3530_s21 }
   0xa   :  { %26 = vsyncpa [#allocation3], 0 }
   0xb   :  { %27 = vsyncpa [#allocation6], 0 }
   0xc   :  { %28 = vsyncpa [#allocation9], 0 }
   0xd   :  { %29 = vsyncpa [#allocation12], 0 }
   0xe   :  { %30 = vsyncpa [#allocation15], 0 }
   0xf   :  { %31 = vsyncpa [#allocation18], 0 }
  0x10   :  { %32 = vsyncpa [#allocation21], 0 }
  0x11   :  { %33 = vsyncpa [#allocation24], 0 }
  0x12   :  { %34 = vsyncpa [#allocation27], 0 }
  0x13   :  { %35 = vsyncpa [#allocation30], 0 }
  0x14   :  { %36 = vsyncpa [#allocation33], 0 }
  0x15   :  { %37 = vsyncpa [#allocation4], 0  ;;  %s2979_s2 = smov [#allocation5]   ;;  %s2980_s26 = smov [#allocation8]  }
  0x16   :  { %s55_s25 = sshll.u32 %s2979_s2, 4  ;;  %s79_s27 = sshll.u32 %s2980_s26, 4  ;;  %s56_s25 = int_to_ptr.vmem [resolvable:$true] %s55_s25  ;;  %s3117_s27 = int_to_ptr.vmem [resolvable:$true] %s79_s27 }
  0x17   :  { %s3549_s29 = sld [smem:[#allocation49_spill]] }
  0x1d   :  { %s2471_s0 = scalar_lea.hbm %s3549_s29, 256 }
  0x1e   :  { %p2472_p0 = scmp.ne.s32.totalorder %s3549_s29, %s2471_s0  ;;  %p2475_p1 = scmp.lt.u32.totalorder %s2471_s0, %s3549_s29 }
  0x20   :  { %p2477_p2 = pnand %p2475_p1, %p2472_p0 }
  0x22   :  { %2480 = shalt.err (!%p2477_p2)
}
  0x23   :  { %s2481_s23 = scalar_lea.vmem %s56_s25, 256  ;;  %p2486_p4 = scmp.lt.s32.totalorder %s56_s25, %s56_s25 }
  0x24   :  { %p2482_p3 = scmp.ne.s32.totalorder %s56_s25, %s2481_s23  ;;  %p2487_p5 = scmp.lt.s32.totalorder %s2481_s23, %s2481_s23 }
  0x26   :  { %p2488_p6 = por %p2487_p5, %p2486_p4 }
  0x28   :  { %p2489_p7 = pnand %p2488_p6, %p2482_p3 }
  0x2a   :  { %2492 = shalt.err (!%p2489_p7)
}
  0x2b   :  { %s2981_s1 = smov 64   ;;  %s2982_s24 = smov 4  }
  0x2c   :  { %61 = dma.hbm_to_vmem [thread:$0]  %s3549_s29, 256, %s56_s25, [#allocation6], %s2981_s1, %s2981_s1, %s2982_s24  }
  0x2d   :  { %s3550_s0 = sld [smem:[#allocation51_spill]] }
  0x33   :  { %s2493_s4 = scalar_lea.hbm %s3550_s0, 1024 }
  0x34   :  { %p2494_p8 = scmp.ne.s32.totalorder %s3550_s0, %s2493_s4  ;;  %p2497_p9 = scmp.lt.u32.totalorder %s2493_s4, %s3550_s0 }
  0x36   :  { %p2499_p10 = pnand %p2497_p9, %p2494_p8 }
  0x38   :  { %2502 = shalt.err (!%p2499_p10)
}
  0x39   :  { %s2503_s21 = scalar_lea.vmem %s3117_s27, 1024  ;;  %p2508_p12 = scmp.lt.s32.totalorder %s3117_s27, %s3117_s27 }
  0x3a   :  { %p2504_p11 = scmp.ne.s32.totalorder %s3117_s27, %s2503_s21  ;;  %p2509_p13 = scmp.lt.s32.totalorder %s2503_s21, %s2503_s21 }
  0x3c   :  { %p2510_p0 = por %p2509_p13, %p2508_p12 }
  0x3e   :  { %p2511_p1 = pnand %p2510_p0, %p2504_p11 }
  0x40   :  { %2514 = shalt.err (!%p2511_p1)
}
  0x41   :  { %85 = dma.hbm_to_vmem [thread:$0]  %s3550_s0, 1024, %s3117_s27, [#allocation9], %s2981_s1, %s2981_s1, %s2982_s24  }
  0x42   :  { %s2983_s2 = smov [#allocation11]   ;;  %s2984_s3 = smov [#allocation14]  }
  0x43   :  { %s102_s26 = sshll.u32 %s2983_s2, 4  ;;  %s121_s28 = sshll.u32 %s2984_s3, 4  ;;  %s103_s26 = int_to_ptr.vmem [resolvable:$true] %s102_s26  ;;  %s3154_s28 = int_to_ptr.vmem [resolvable:$true] %s121_s28 }
  0x44   :  { %s3551_s30 = sld [smem:[#allocation53_spill]] }
  0x4a   :  { %s2515_s5 = scalar_lea.hbm %s3551_s30, 16 }
  0x4b   :  { %p2516_p2 = scmp.ne.s32.totalorder %s3551_s30, %s2515_s5  ;;  %p2519_p3 = scmp.lt.u32.totalorder %s2515_s5, %s3551_s30 }
  0x4d   :  { %p2521_p4 = pnand %p2519_p3, %p2516_p2 }
  0x4f   :  { %2524 = shalt.err (!%p2521_p4)
}
  0x50   :  { %s2525_s27 = scalar_lea.vmem %s103_s26, 16  ;;  %s2529_s0 = scalar_lea.vmem %s103_s26, 32 }
  0x51   :  { %p2526_p5 = scmp.ne.s32.totalorder %s103_s26, %s2525_s27  ;;  %p2530_p6 = scmp.lt.s32.totalorder %s103_s26, %s103_s26 }
  0x52   :  { %p2531_p7 = scmp.lt.s32.totalorder %s2529_s0, %s2525_s27 }
  0x54   :  { %p2532_p8 = por %p2531_p7, %p2530_p6 }
  0x56   :  { %p2533_p9 = pnand %p2532_p8, %p2526_p5 }
  0x58   :  { %2536 = shalt.err (!%p2533_p9)
}
  0x59   :  { %105 = dma.hbm_to_vmem [thread:$0]  %s3551_s30, 16, %s103_s26, [#allocation12]  }
  0x5a   :  { %s2537_s4 = scalar_lea.hbm %s3516_s7, 1024 }
  0x5b   :  { %p2538_p10 = scmp.ne.s32.totalorder %s3516_s7, %s2537_s4  ;;  %p2541_p11 = scmp.lt.u32.totalorder %s2537_s4, %s3516_s7 }
  0x5d   :  { %p2543_p12 = pnand %p2541_p11, %p2538_p10 }
  0x5f   :  { %2546 = shalt.err (!%p2543_p12)
}
  0x60   :  { %s2547_s22 = scalar_lea.vmem %s3154_s28, 1024  ;;  %p2552_p0 = scmp.lt.s32.totalorder %s3154_s28, %s3154_s28 }
  0x61   :  { %p2548_p13 = scmp.ne.s32.totalorder %s3154_s28, %s2547_s22  ;;  %p2553_p1 = scmp.lt.s32.totalorder %s2547_s22, %s2547_s22 }
  0x63   :  { %p2554_p2 = por %p2553_p1, %p2552_p0 }
  0x65   :  { %p2555_p3 = pnand %p2554_p2, %p2548_p13 }
  0x67   :  { %2558 = shalt.err (!%p2555_p3)
}
  0x68   :  { %127 = dma.hbm_to_vmem [thread:$0]  %s3516_s7, 1024, %s3154_s28, [#allocation15], %s2981_s1, %s2981_s1, %s2982_s24  }
  0x69   :  { %s2985_s23 = smov [#allocation17]   ;;  %s2986_s0 = smov [#allocation20]  }
  0x6a   :  { %s146_s27 = sshll.u32 %s2985_s23, 4  ;;  %s166_s25 = sshll.u32 %s2986_s0, 4  ;;  %s147_s27 = int_to_ptr.vmem [resolvable:$true] %s146_s27  ;;  %s167_s25 = int_to_ptr.vmem [resolvable:$true] %s166_s25 }
  0x6b   :  { %s2559_s3 = scalar_lea.hbm %s3518_s9, 16 }
  0x6c   :  { %p2560_p4 = scmp.ne.s32.totalorder %s3518_s9, %s2559_s3  ;;  %p2563_p5 = scmp.lt.u32.totalorder %s2559_s3, %s3518_s9 }
  0x6e   :  { %p2565_p6 = pnand %p2563_p5, %p2560_p4 }
  0x70   :  { %2568 = shalt.err (!%p2565_p6)
}
  0x71   :  { %s2569_s7 = scalar_lea.vmem %s147_s27, 16  ;;  %s2573_s28 = scalar_lea.vmem %s147_s27, 32 }
  0x72   :  { %p2570_p7 = scmp.ne.s32.totalorder %s147_s27, %s2569_s7  ;;  %p2574_p8 = scmp.lt.s32.totalorder %s147_s27, %s147_s27 }
  0x73   :  { %p2575_p9 = scmp.lt.s32.totalorder %s2573_s28, %s2569_s7 }
  0x75   :  { %p2576_p10 = por %p2575_p9, %p2574_p8 }
  0x77   :  { %p2577_p11 = pnand %p2576_p10, %p2570_p7 }
  0x79   :  { %2580 = shalt.err (!%p2577_p11)
}
  0x7a   :  { %149 = dma.hbm_to_vmem [thread:$0]  %s3518_s9, 16, %s147_s27, [#allocation18]  }
  0x7b   :  { %s2581_s23 = scalar_lea.hbm %s3520_s11, 16 }
  0x7c   :  { %p2582_p12 = scmp.ne.s32.totalorder %s3520_s11, %s2581_s23  ;;  %p2585_p13 = scmp.lt.u32.totalorder %s2581_s23, %s3520_s11 }
  0x7e   :  { %p2587_p0 = pnand %p2585_p13, %p2582_p12 }
  0x80   :  { %2590 = shalt.err (!%p2587_p0)
}
  0x81   :  { %s2591_s4 = scalar_lea.vmem %s167_s25, 16  ;;  %s2595_s18 = scalar_lea.vmem %s167_s25, 32 }
  0x82   :  { %p2592_p1 = scmp.ne.s32.totalorder %s167_s25, %s2591_s4  ;;  %p2596_p2 = scmp.lt.s32.totalorder %s167_s25, %s167_s25 }
  0x83   :  { %p2597_p3 = scmp.lt.s32.totalorder %s2595_s18, %s2591_s4 }
  0x85   :  { %p2598_p4 = por %p2597_p3, %p2596_p2 }
  0x87   :  { %p2599_p5 = pnand %p2598_p4, %p2592_p1 }
  0x89   :  { %2602 = shalt.err (!%p2599_p5)
}
  0x8a   :  { %169 = dma.hbm_to_vmem [thread:$0]  %s3520_s11, 16, %s167_s25, [#allocation21]  }
  0x8b   :  { %s2987_s20 = smov [#allocation23]   ;;  %s2988_s7 = smov [#allocation26]  }
  0x8c   :  { %s187_s21 = sshll.u32 %s2987_s20, 4  ;;  %s210_s28 = sshll.u32 %s2988_s7, 4  ;;  %s188_s21 = int_to_ptr.vmem [resolvable:$true] %s187_s21  ;;  %s211_s28 = int_to_ptr.vmem [resolvable:$true] %s210_s28 }
  0x8d   :  { %s2603_s26 = scalar_lea.hbm %s3522_s13, 1024 }
  0x8e   :  { %p2604_p6 = scmp.ne.s32.totalorder %s3522_s13, %s2603_s26  ;;  %p2607_p7 = scmp.lt.u32.totalorder %s2603_s26, %s3522_s13 }
  0x90   :  { %p2609_p8 = pnand %p2607_p7, %p2604_p6 }
  0x92   :  { %2612 = shalt.err (!%p2609_p8)
}
  0x93   :  { %s2613_s11 = scalar_lea.vmem %s188_s21, 1024  ;;  %p2618_p10 = scmp.lt.s32.totalorder %s188_s21, %s188_s21 }
  0x94   :  { %p2614_p9 = scmp.ne.s32.totalorder %s188_s21, %s2613_s11  ;;  %p2619_p11 = scmp.lt.s32.totalorder %s2613_s11, %s2613_s11 }
  0x96   :  { %p2620_p12 = por %p2619_p11, %p2618_p10 }
  0x98   :  { %p2621_p13 = pnand %p2620_p12, %p2614_p9 }
  0x9a   :  { %2624 = shalt.err (!%p2621_p13)
}
  0x9b   :  { %193 = dma.hbm_to_vmem [thread:$0]  %s3522_s13, 1024, %s188_s21, [#allocation24], %s2981_s1, %s2981_s1, %s2982_s24  }
  0x9c   :  { %s2625_s18 = scalar_lea.hbm %s3524_s15, 16 }
  0x9d   :  { %p2626_p0 = scmp.ne.s32.totalorder %s3524_s15, %s2625_s18  ;;  %p2629_p1 = scmp.lt.u32.totalorder %s2625_s18, %s3524_s15 }
  0x9f   :  { %p2631_p2 = pnand %p2629_p1, %p2626_p0 }
  0xa1   :  { %2634 = shalt.err (!%p2631_p2)
}
  0xa2   :  { %s2635_s5 = scalar_lea.vmem %s211_s28, 16  ;;  %s2639_s22 = scalar_lea.vmem %s211_s28, 32 }
  0xa3   :  { %p2636_p3 = scmp.ne.s32.totalorder %s211_s28, %s2635_s5  ;;  %p2640_p4 = scmp.lt.s32.totalorder %s211_s28, %s211_s28 }
  0xa4   :  { %p2641_p5 = scmp.lt.s32.totalorder %s2639_s22, %s2635_s5 }
  0xa6   :  { %p2642_p6 = por %p2641_p5, %p2640_p4 }
  0xa8   :  { %p2643_p7 = pnand %p2642_p6, %p2636_p3 }
  0xaa   :  { %2646 = shalt.err (!%p2643_p7)
}
  0xab   :  { %213 = dma.hbm_to_vmem [thread:$0]  %s3524_s15, 16, %s211_s28, [#allocation27]  }
  0xac   :  { %s2989_s26 = smov [#allocation29]   ;;  %s2990_s23 = smov [#allocation32]  }
  0xad   :  { %s229_s30 = sshll.u32 %s2989_s26, 4  ;;  %s253_s0 = sshll.u32 %s2990_s23, 4  ;;  %s230_s30 = int_to_ptr.vmem [resolvable:$true] %s229_s30  ;;  %s3239_s0 = int_to_ptr.vmem [resolvable:$true] %s253_s0 }
  0xae   :  { %s2647_s25 = scalar_lea.hbm %s3526_s17, 1024 }
  0xaf   :  { %p2648_p8 = scmp.ne.s32.totalorder %s3526_s17, %s2647_s25  ;;  %p2651_p9 = scmp.lt.u32.totalorder %s2647_s25, %s3526_s17 }
  0xb1   :  { %p2653_p10 = pnand %p2651_p9, %p2648_p8 }
  0xb3   :  { %2656 = shalt.err (!%p2653_p10)
}
  0xb4   :  { %s2657_s15 = scalar_lea.vmem %s230_s30, 1024  ;;  %p2662_p12 = scmp.lt.s32.totalorder %s230_s30, %s230_s30 }
  0xb5   :  { %p2658_p11 = scmp.ne.s32.totalorder %s230_s30, %s2657_s15  ;;  %p2663_p13 = scmp.lt.s32.totalorder %s2657_s15, %s2657_s15 }
  0xb7   :  { %p2664_p0 = por %p2663_p13, %p2662_p12 }
  0xb9   :  { %p2665_p1 = pnand %p2664_p0, %p2658_p11 }
  0xbb   :  { %2668 = shalt.err (!%p2665_p1)
}
  0xbc   :  { %235 = dma.hbm_to_vmem [thread:$0]  %s3526_s17, 1024, %s230_s30, [#allocation30], %s2981_s1, %s2981_s1, %s2982_s24  }
  0xbd   :  { %s2669_s7 = scalar_lea.hbm %s3528_s19, 1024 }
  0xbe   :  { %p2670_p2 = scmp.ne.s32.totalorder %s3528_s19, %s2669_s7  ;;  %p2673_p3 = scmp.lt.u32.totalorder %s2669_s7, %s3528_s19 }
  0xc0   :  { %p2675_p4 = pnand %p2673_p3, %p2670_p2 }
  0xc2   :  { %2678 = shalt.err (!%p2675_p4)
}
  0xc3   :  { %s2679_s26 = scalar_lea.vmem %s3239_s0, 1024  ;;  %p2684_p6 = scmp.lt.s32.totalorder %s3239_s0, %s3239_s0 }
  0xc4   :  { %p2680_p5 = scmp.ne.s32.totalorder %s3239_s0, %s2679_s26  ;;  %p2685_p7 = scmp.lt.s32.totalorder %s2679_s26, %s2679_s26 }
  0xc6   :  { %p2686_p8 = por %p2685_p7, %p2684_p6 }
  0xc8   :  { %p2687_p9 = pnand %p2686_p8, %p2680_p5 }
  0xca   :  { %2690 = shalt.err (!%p2687_p9)
}
  0xcb   :  { %259 = dma.hbm_to_vmem [thread:$0]  %s3528_s19, 1024, %s3239_s0, [#allocation33], %s2981_s1, %s2981_s1, %s2982_s24  }
  0xcc   :  { %s2991_s23 = smov [#allocation2]   ;;  %s2992_s11 = smov [#allocation7]  }
  0xcd   :  { %s43_s29 = sshll.u32 %s2991_s23, 4  ;;  %s67_s25 = sshll.u32 %s2992_s11, 4  ;;  %s44_s29 = int_to_ptr.vmem [resolvable:$true] %s43_s29  ;;  %s3276_s25 = int_to_ptr.vmem [resolvable:$true] %s67_s25 }
  0xce   :  { %s3552_s4 = sld [smem:[#allocation48_spill]] }
  0xd4   :  { %s2691_s18 = scalar_lea.hbm %s3552_s4, 256 }
  0xd5   :  { %p2692_p10 = scmp.ne.s32.totalorder %s3552_s4, %s2691_s18  ;;  %p2695_p11 = scmp.lt.u32.totalorder %s2691_s18, %s3552_s4 }
  0xd7   :  { %p2697_p12 = pnand %p2695_p11, %p2692_p10 }
  0xd9   :  { %2700 = shalt.err (!%p2697_p12)
}
  0xda   :  { %s2701_s19 = scalar_lea.vmem %s44_s29, 256  ;;  %p2706_p0 = scmp.lt.s32.totalorder %s44_s29, %s44_s29 }
  0xdb   :  { %p2702_p13 = scmp.ne.s32.totalorder %s44_s29, %s2701_s19  ;;  %p2707_p1 = scmp.lt.s32.totalorder %s2701_s19, %s2701_s19 }
  0xdd   :  { %p2708_p2 = por %p2707_p1, %p2706_p0 }
  0xdf   :  { %p2709_p3 = pnand %p2708_p2, %p2702_p13 }
  0xe1   :  { %2712 = shalt.err (!%p2709_p3)
}
  0xe2   :  { %49 = dma.hbm_to_vmem [thread:$0]  %s3552_s4, 256, %s44_s29, [#allocation3], %s2981_s1, %s2981_s1, %s2982_s24  }
  0xe3   :  { %s3553_s22 = sld [smem:[#allocation50_spill]] }
  0xe9   :  { %s2713_s13 = scalar_lea.hbm %s3553_s22, 1024 }
  0xea   :  { %p2714_p4 = scmp.ne.s32.totalorder %s3553_s22, %s2713_s13  ;;  %p2717_p5 = scmp.lt.u32.totalorder %s2713_s13, %s3553_s22 }
  0xec   :  { %p2719_p6 = pnand %p2717_p5, %p2714_p4 }
  0xee   :  { %2722 = shalt.err (!%p2719_p6)
}
  0xef   :  { %s2723_s23 = scalar_lea.vmem %s3276_s25, 1024  ;;  %p2728_p8 = scmp.lt.s32.totalorder %s3276_s25, %s3276_s25 }
  0xf0   :  { %p2724_p7 = scmp.ne.s32.totalorder %s3276_s25, %s2723_s23  ;;  %p2729_p9 = scmp.lt.s32.totalorder %s2723_s23, %s2723_s23 }
  0xf2   :  { %p2730_p10 = por %p2729_p9, %p2728_p8 }
  0xf4   :  { %p2731_p11 = pnand %p2730_p10, %p2724_p7 }
  0xf6   :  { %2734 = shalt.err (!%p2731_p11)
}
  0xf7   :  { %73 = dma.hbm_to_vmem [thread:$0]  %s3553_s22, 1024, %s3276_s25, [#allocation6], %s2981_s1, %s2981_s1, %s2982_s24  }
  0xf8   :  { %s2993_s2 = smov [#allocation10]   ;;  %s2994_s4 = smov [#allocation13]  }
  0xf9   :  { %s92_s3 = sshll.u32 %s2993_s2, 4  ;;  %s112_s18 = sshll.u32 %s2994_s4, 4  ;;  %s93_s3 = int_to_ptr.vmem [resolvable:$true] %s92_s3  ;;  %s113_s18 = int_to_ptr.vmem [resolvable:$true] %s112_s18 }
  0xfa   :  { %s3554_s9 = sld [smem:[#allocation52_spill]] }
 0x100   :  { %s2735_s27 = scalar_lea.hbm %s3554_s9, 16 }
 0x101   :  { %p2736_p12 = scmp.ne.s32.totalorder %s3554_s9, %s2735_s27  ;;  %p2739_p13 = scmp.lt.u32.totalorder %s2735_s27, %s3554_s9 }
 0x103   :  { %p2741_p0 = pnand %p2739_p13, %p2736_p12 }
 0x105   :  { %2744 = shalt.err (!%p2741_p0)
}
 0x106   :  { %s2745_s25 = scalar_lea.vmem %s93_s3, 16  ;;  %s2749_s5 = scalar_lea.vmem %s93_s3, 32 }
 0x107   :  { %p2746_p1 = scmp.ne.s32.totalorder %s93_s3, %s2745_s25  ;;  %p2750_p2 = scmp.lt.s32.totalorder %s93_s3, %s93_s3 }
 0x108   :  { %p2751_p3 = scmp.lt.s32.totalorder %s2749_s5, %s2745_s25 }
 0x10a   :  { %p2752_p4 = por %p2751_p3, %p2750_p2 }
 0x10c   :  { %p2753_p5 = pnand %p2752_p4, %p2746_p1 }
 0x10e   :  { %2756 = shalt.err (!%p2753_p5)
}
 0x10f   :  { %95 = dma.hbm_to_vmem [thread:$0]  %s3554_s9, 16, %s93_s3, [#allocation9]  }
 0x110   :  { %s2757_s17 = scalar_lea.hbm %s3515_s6, 16 }
 0x111   :  { %p2758_p6 = scmp.ne.s32.totalorder %s3515_s6, %s2757_s17  ;;  %p2761_p7 = scmp.lt.u32.totalorder %s2757_s17, %s3515_s6 }
 0x113   :  { %p2763_p8 = pnand %p2761_p7, %p2758_p6 }
 0x115   :  { %2766 = shalt.err (!%p2763_p8)
}
 0x116   :  { %s2767_s2 = scalar_lea.vmem %s113_s18, 16  ;;  %s2771_s4 = scalar_lea.vmem %s113_s18, 32 }
 0x117   :  { %p2768_p9 = scmp.ne.s32.totalorder %s113_s18, %s2767_s2  ;;  %p2772_p10 = scmp.lt.s32.totalorder %s113_s18, %s113_s18 }
 0x118   :  { %p2773_p11 = scmp.lt.s32.totalorder %s2771_s4, %s2767_s2 }
 0x11a   :  { %p2774_p12 = por %p2773_p11, %p2772_p10 }
 0x11c   :  { %p2775_p13 = pnand %p2774_p12, %p2768_p9 }
 0x11e   :  { %2778 = shalt.err (!%p2775_p13)
}
 0x11f   :  { %115 = dma.hbm_to_vmem [thread:$0]  %s3515_s6, 16, %s113_s18, [#allocation12]  }
 0x120   :  { %s2995_s28 = smov [#allocation16]   ;;  %s2996_s27 = smov [#allocation19]  }
 0x121   :  { %s133_s9 = sshll.u32 %s2995_s28, 4  ;;  %s156_s19 = sshll.u32 %s2996_s27, 4  ;;  %s134_s9 = int_to_ptr.vmem [resolvable:$true] %s133_s9  ;;  %s157_s19 = int_to_ptr.vmem [resolvable:$true] %s156_s19 }
 0x122   :  { %s2779_s7 = scalar_lea.hbm %s3517_s8, 1024 }
 0x123   :  { %p2780_p0 = scmp.ne.s32.totalorder %s3517_s8, %s2779_s7  ;;  %p2783_p1 = scmp.lt.u32.totalorder %s2779_s7, %s3517_s8 }
 0x125   :  { %p2785_p2 = pnand %p2783_p1, %p2780_p0 }
 0x127   :  { %2788 = shalt.err (!%p2785_p2)
}
 0x128   :  { %s2789_s6 = scalar_lea.vmem %s134_s9, 1024  ;;  %p2794_p4 = scmp.lt.s32.totalorder %s134_s9, %s134_s9 }
 0x129   :  { %p2790_p3 = scmp.ne.s32.totalorder %s134_s9, %s2789_s6  ;;  %p2795_p5 = scmp.lt.s32.totalorder %s2789_s6, %s2789_s6 }
 0x12b   :  { %p2796_p6 = por %p2795_p5, %p2794_p4 }
 0x12d   :  { %p2797_p7 = pnand %p2796_p6, %p2790_p3 }
 0x12f   :  { %2800 = shalt.err (!%p2797_p7)
}
 0x130   :  { %139 = dma.hbm_to_vmem [thread:$0]  %s3517_s8, 1024, %s134_s9, [#allocation15], %s2981_s1, %s2981_s1, %s2982_s24  }
 0x131   :  { %s2801_s30 = scalar_lea.hbm %s3519_s10, 16 }
 0x132   :  { %p2802_p8 = scmp.ne.s32.totalorder %s3519_s10, %s2801_s30  ;;  %p2805_p9 = scmp.lt.u32.totalorder %s2801_s30, %s3519_s10 }
 0x134   :  { %p2807_p10 = pnand %p2805_p9, %p2802_p8 }
 0x136   :  { %2810 = shalt.err (!%p2807_p10)
}
 0x137   :  { %s2811_s4 = scalar_lea.vmem %s157_s19, 16  ;;  %s2815_s3 = scalar_lea.vmem %s157_s19, 32 }
 0x138   :  { %p2812_p11 = scmp.ne.s32.totalorder %s157_s19, %s2811_s4  ;;  %p2816_p12 = scmp.lt.s32.totalorder %s157_s19, %s157_s19 }
 0x139   :  { %p2817_p13 = scmp.lt.s32.totalorder %s2815_s3, %s2811_s4 }
 0x13b   :  { %p2818_p0 = por %p2817_p13, %p2816_p12 }
 0x13d   :  { %p2819_p1 = pnand %p2818_p0, %p2812_p11 }
 0x13f   :  { %2822 = shalt.err (!%p2819_p1)
}
 0x140   :  { %159 = dma.hbm_to_vmem [thread:$0]  %s3519_s10, 16, %s157_s19, [#allocation18]  }
 0x141   :  { %s2997_s28 = smov [#allocation22]   ;;  %s2998_s27 = smov [#allocation25]  }
 0x142   :  { %s175_s9 = sshll.u32 %s2997_s28, 4  ;;  %s200_s0 = sshll.u32 %s2998_s27, 4  ;;  %s176_s9 = int_to_ptr.vmem [resolvable:$true] %s175_s9  ;;  %s201_s0 = int_to_ptr.vmem [resolvable:$true] %s200_s0 }
 0x143   :  { %s2823_s25 = scalar_lea.hbm %s3521_s12, 1024 }
 0x144   :  { %p2824_p2 = scmp.ne.s32.totalorder %s3521_s12, %s2823_s25  ;;  %p2827_p3 = scmp.lt.u32.totalorder %s2823_s25, %s3521_s12 }
 0x146   :  { %p2829_p4 = pnand %p2827_p3, %p2824_p2 }
 0x148   :  { %2832 = shalt.err (!%p2829_p4)
}
 0x149   :  { %s2833_s10 = scalar_lea.vmem %s176_s9, 1024  ;;  %p2838_p6 = scmp.lt.s32.totalorder %s176_s9, %s176_s9 }
 0x14a   :  { %p2834_p5 = scmp.ne.s32.totalorder %s176_s9, %s2833_s10  ;;  %p2839_p7 = scmp.lt.s32.totalorder %s2833_s10, %s2833_s10 }
 0x14c   :  { %p2840_p8 = por %p2839_p7, %p2838_p6 }
 0x14e   :  { %p2841_p9 = pnand %p2840_p8, %p2834_p5 }
 0x150   :  { %2844 = shalt.err (!%p2841_p9)
}
 0x151   :  { %181 = dma.hbm_to_vmem [thread:$0]  %s3521_s12, 1024, %s176_s9, [#allocation21], %s2981_s1, %s2981_s1, %s2982_s24  }
 0x152   :  { %s2845_s17 = scalar_lea.hbm %s3523_s14, 16 }
 0x153   :  { %p2846_p10 = scmp.ne.s32.totalorder %s3523_s14, %s2845_s17  ;;  %p2849_p11 = scmp.lt.u32.totalorder %s2845_s17, %s3523_s14 }
 0x155   :  { %p2851_p12 = pnand %p2849_p11, %p2846_p10 }
 0x157   :  { %2854 = shalt.err (!%p2851_p12)
}
 0x158   :  { %s2855_s2 = scalar_lea.vmem %s201_s0, 16  ;;  %s2859_s4 = scalar_lea.vmem %s201_s0, 32 }
 0x159   :  { %p2856_p13 = scmp.ne.s32.totalorder %s201_s0, %s2855_s2  ;;  %p2860_p0 = scmp.lt.s32.totalorder %s201_s0, %s201_s0 }
 0x15a   :  { %p2861_p1 = scmp.lt.s32.totalorder %s2859_s4, %s2855_s2 }
 0x15c   :  { %p2862_p2 = por %p2861_p1, %p2860_p0 }
 0x15e   :  { %p2863_p3 = pnand %p2862_p2, %p2856_p13 }
 0x160   :  { %2866 = shalt.err (!%p2863_p3)
}
 0x161   :  { %203 = dma.hbm_to_vmem [thread:$0]  %s3523_s14, 16, %s201_s0, [#allocation24]  }
 0x162   :  { %s2999_s8 = smov [#allocation28]   ;;  %s3000_s28 = smov [#allocation31]  }
 0x163   :  { %s220_s15 = sshll.u32 %s2999_s8, 4  ;;  %s241_s9 = sshll.u32 %s3000_s28, 4  ;;  %s221_s15 = int_to_ptr.vmem [resolvable:$true] %s220_s15  ;;  %s3391_s9 = int_to_ptr.vmem [resolvable:$true] %s241_s9 }
 0x164   :  { %s2867_s7 = scalar_lea.hbm %s3525_s16, 16 }
 0x165   :  { %p2868_p4 = scmp.ne.s32.totalorder %s3525_s16, %s2867_s7  ;;  %p2871_p5 = scmp.lt.u32.totalorder %s2867_s7, %s3525_s16 }
 0x167   :  { %p2873_p6 = pnand %p2871_p5, %p2868_p4 }
 0x169   :  { %2876 = shalt.err (!%p2873_p6)
}
 0x16a   :  { %s2877_s14 = scalar_lea.vmem %s221_s15, 16  ;;  %s2881_s0 = scalar_lea.vmem %s221_s15, 32 }
 0x16b   :  { %p2878_p7 = scmp.ne.s32.totalorder %s221_s15, %s2877_s14  ;;  %p2882_p8 = scmp.lt.s32.totalorder %s221_s15, %s221_s15 }
 0x16c   :  { %p2883_p9 = scmp.lt.s32.totalorder %s2881_s0, %s2877_s14 }
 0x16e   :  { %p2884_p10 = por %p2883_p9, %p2882_p8 }
 0x170   :  { %p2885_p11 = pnand %p2884_p10, %p2878_p7 }
 0x172   :  { %2888 = shalt.err (!%p2885_p11)
}
 0x173   :  { %223 = dma.hbm_to_vmem [thread:$0]  %s3525_s16, 16, %s221_s15, [#allocation27]  }
 0x174   :  { %s3555_s21 = sld [smem:[#allocation54_spill]] }
 0x17a   :  { %s2889_s26 = scalar_lea.hbm %s3555_s21, 1024 }
 0x17b   :  { %p2890_p12 = scmp.ne.s32.totalorder %s3555_s21, %s2889_s26  ;;  %p2893_p13 = scmp.lt.u32.totalorder %s2889_s26, %s3555_s21 }
 0x17d   :  { %p2895_p0 = pnand %p2893_p13, %p2890_p12 }
 0x17f   :  { %2898 = shalt.err (!%p2895_p0)
}
 0x180   :  { %s2899_s11 = scalar_lea.vmem %s3391_s9, 1024  ;;  %p2904_p2 = scmp.lt.s32.totalorder %s3391_s9, %s3391_s9 }
 0x181   :  { %p2900_p1 = scmp.ne.s32.totalorder %s3391_s9, %s2899_s11  ;;  %p2905_p3 = scmp.lt.s32.totalorder %s2899_s11, %s2899_s11 }
 0x183   :  { %p2906_p4 = por %p2905_p3, %p2904_p2 }
 0x185   :  { %p2907_p5 = pnand %p2906_p4, %p2900_p1 }
 0x187   :  { %2910 = shalt.err (!%p2907_p5)
}
 0x188   :  { %247 = dma.hbm_to_vmem [thread:$0]  %s3555_s21, 1024, %s3391_s9, [#allocation30], %s2981_s1, %s2981_s1, %s2982_s24  }
 0x189   :  { %s3001_s4 = smov [#allocation34]   ;;  %s3556_s15 = sld [smem:[#allocation55_spill]] }
 0x18a   :  { %s266_s12 = sshll.u32 %s3001_s4, 4  ;;  %s267_s12 = int_to_ptr.vmem [resolvable:$true] %s266_s12 }
 0x18f   :  { %s2911_s28 = scalar_lea.hbm %s3556_s15, 16 }
 0x190   :  { %p2912_p6 = scmp.ne.s32.totalorder %s3556_s15, %s2911_s28  ;;  %p2915_p7 = scmp.lt.u32.totalorder %s2911_s28, %s3556_s15 }
 0x192   :  { %p2917_p8 = pnand %p2915_p7, %p2912_p6 }
 0x194   :  { %2920 = shalt.err (!%p2917_p8)
}
 0x195   :  { %s2921_s5 = scalar_lea.vmem %s267_s12, 16  ;;  %s2925_s1 = scalar_lea.vmem %s267_s12, 32 }
 0x196   :  { %p2922_p9 = scmp.ne.s32.totalorder %s267_s12, %s2921_s5  ;;  %p2926_p10 = scmp.lt.s32.totalorder %s267_s12, %s267_s12 }
 0x197   :  { %p2927_p11 = scmp.lt.s32.totalorder %s2925_s1, %s2921_s5 }
 0x199   :  { %p2928_p12 = por %p2927_p11, %p2926_p10 }
 0x19b   :  { %p2929_p13 = pnand %p2928_p12, %p2922_p9 }
 0x19d   :  { %2932 = shalt.err (!%p2929_p13)
}
 0x19e   :  { %269 = dma.hbm_to_vmem [thread:$0]  %s3556_s15, 16, %s267_s12, [#allocation33]  }
 0x19f   :  { %2955 = dma.done.wait [#allocation3], 256  }
 0x1a0   :  { %2956 = vsyncadd [#allocation3], 4294967040 }
 0x1a1   :  { %2957 = dma.done.wait [#allocation6], 1280  }
 0x1a2   :  { %2958 = vsyncadd [#allocation6], 4294966016 }
 0x1a3   :  { %2959 = dma.done.wait [#allocation9], 1040  }
 0x1a4   :  { %2960 = vsyncadd [#allocation9], 4294966256 }
 0x1a5   :  { %2961 = dma.done.wait [#allocation12], 32  }
 0x1a6   :  { %2962 = vsyncadd [#allocation12], 4294967264 }
 0x1a7   :  { %2963 = dma.done.wait [#allocation15], 2048  }
 0x1a8   :  { %2964 = vsyncadd [#allocation15], 4294965248 }
 0x1a9   :  { %2965 = dma.done.wait [#allocation18], 32  }
 0x1aa   :  { %2966 = vsyncadd [#allocation18], 4294967264 }
 0x1ab   :  { %2967 = dma.done.wait [#allocation21], 1040  }
 0x1ac   :  { %2968 = vsyncadd [#allocation21], 4294966256 }
 0x1ad   :  { %2969 = dma.done.wait [#allocation24], 1040  }
 0x1ae   :  { %2970 = vsyncadd [#allocation24], 4294966256 }
 0x1af   :  { %2971 = dma.done.wait [#allocation27], 32  }
 0x1b0   :  { %2972 = vsyncadd [#allocation27], 4294967264 }
 0x1b1   :  { %2973 = dma.done.wait [#allocation30], 2048  }
 0x1b2   :  { %2974 = vsyncadd [#allocation30], 4294965248 }
 0x1b3   :  { %2975 = dma.done.wait [#allocation33], 1040  }
 0x1b4   :  { %2976 = vsyncadd [#allocation33], 4294966256  ;;  %v2009_v0 = vld [vmem:[#allocation5] sm:$0xff]   ;;  %vm346_vm0 = vcmask 130048   ;;  %v2016_v1 = vld [vmem:[#allocation5 + $0x8] sm:$0xff]   ;;  %v3002_v11 = vmov 0.0  }
 0x1b5   :  { %v2010_v2 = vunpack.c.l.bf16 %v2009_v0  ;;  %v2014_v3 = vunpack.c.l.bf16 %v2016_v1  ;;  %v2011_v4 = vunpack.c.h.bf16 %v2009_v0  ;;  %v2015_v5 = vunpack.c.h.bf16 %v2016_v1  ;;  %v2383_v10 = vld [vmem:[#allocation2] sm:$0xff]   ;;  %2119 = vmatprep.subr.bf16.mxu0 %v3002_v11  ;;  %2177 = vmatprep.subr.bf16.mxu1 %v3002_v11  ;;  %v2384_v24 = vld [vmem:[#allocation2 + $0x8] sm:$0xff]   ;;  %v2387_v33 = vld [vmem:[#allocation8 + $0x10] sm:$0xff]   ;;  %s3004_s22 = smov [#allocation35]  }
 0x1b6   :  { %2120 = vmatpush3.bf16.msra.mxu0 %v2383_v10  ;;  %vm3003_vm1 = vmmov 0   ;;  %v2385_v27 = vld [vmem:[#allocation8] sm:$0xff]   ;;  %v2386_v32 = vld [vmem:[#allocation8 + $0x8] sm:$0xff]   ;;  %v2388_v34 = vld [vmem:[#allocation8 + $0x18] sm:$0xff]   ;;  %s1902_s13 = sshll.u32 %s3004_s22, 4  ;;  %s1903_s13 = int_to_ptr.vmem [resolvable:$true] %s1902_s13 }
 0x1b7   :  { %v347_v6 = vsel %vm346_vm0, %v2010_v2, 0.0  ;;  %v353_v7 = vsel %vm346_vm0, %v2014_v3, 0.0  ;;  %v350_v8 = vsel %vm346_vm0, %v2011_v4, 0.0  ;;  %v356_v9 = vsel %vm346_vm0, %v2015_v5, 0.0  ;;  %2121 = vmatprep.mubr.msk.bf16.mxu0 %vm3003_vm1, %v3002_v11  ;;  %2125 = vmatprep.subr.bf16.mxu0 %v3002_v11  ;;  %v2389_v35 = vld [vmem:[#allocation8 + $0x20] sm:$0xff]   ;;  %v2390_v36 = vld [vmem:[#allocation8 + $0x28] sm:$0xff]   ;;  %p2938_p1 = scmp.lt.s32.totalorder %s1903_s13, %s1903_s13 }
 0x1b8   :  { %348 = vadd.xlane.f32.xlu0 %v347_v6  ;;  %354 = vadd.xlane.f32.xlu1 %v353_v7  ;;  %v2391_v37 = vld [vmem:[#allocation8 + $0x30] sm:$0xff]   ;;  %v2392_v38 = vld [vmem:[#allocation8 + $0x38] sm:$0xff]   ;;  %v2393_v39 = vld [vmem:[#allocation7] sm:$0xff]   ;;  %s2933_s14 = scalar_lea.vmem %s1903_s13, 512 }
 0x1b9   :  { %2179 = vmatprep.mubr.msk.bf16.mxu1 %vm3003_vm1, %v3002_v11  ;;  %v2394_v40 = vld [vmem:[#allocation7 + $0x8] sm:$0xff]   ;;  %v2395_v41 = vld [vmem:[#allocation7 + $0x10] sm:$0xff]   ;;  %v2396_v42 = vld [vmem:[#allocation7 + $0x18] sm:$0xff]   ;;  %p2934_p0 = scmp.ne.s32.totalorder %s1903_s13, %s2933_s14  ;;  %p2939_p2 = scmp.lt.s32.totalorder %s2933_s14, %s2933_s14 }
 0x1ba   :  { %v2397_v43 = vld [vmem:[#allocation7 + $0x20] sm:$0xff]   ;;  %v2398_v44 = vld [vmem:[#allocation7 + $0x28] sm:$0xff]   ;;  %v2399_v45 = vld [vmem:[#allocation7 + $0x30] sm:$0xff]  }
 0x1bb   :  { %v2400_v46 = vld [vmem:[#allocation7 + $0x38] sm:$0xff]   ;;  %v1944_v57 = vld [vmem:[#allocation10] ss:$0 sm:$0xff]  ;;  %p2940_p3 = por %p2939_p2, %p2938_p1 }
 0x1bc   :  { %351 = vadd.xlane.f32.xlu0 %v350_v8  ;;  %357 = vadd.xlane.f32.xlu1 %v356_v9 }
 0x1bd   :  { %p2941_p4 = pnand %p2940_p3, %p2934_p0 }
 0x245   :  { %v349_v12 = vpop.xlane.xlu0 %348  ;;  %v355_v13 = vpop.xlane.xlu1 %354 }
 0x246   :  { %v359_v14 = vmax.f32 %v349_v12, 1.0  ;;  %v361_v18 = vmax.f32 %v355_v13, 1.0 }
 0x248   :  { %2457 = vrcp.f32 %v359_v14 }
 0x249   :  { %v352_v15 = vpop.xlane.xlu0 %351  ;;  %v358_v16 = vpop.xlane.xlu1 %357 }
 0x24a   :  { %v360_v17 = vmax.f32 %v352_v15, 1.0  ;;  %v362_v19 = vmax.f32 %v358_v16, 1.0 }
 0x24c   :  { %2459 = vrcp.f32 %v360_v17 }
 0x24d   :  { %2461 = vrcp.f32 %v361_v18 }
 0x24e   :  { %2463 = vrcp.f32 %v362_v19 }
 0x252   :  { %v2458_v20 = vpop.eup %2457 }
 0x253   :  { %v367_v22 = vmul.f32 %v2458_v20, %v2010_v2 }
 0x256   :  { %v2460_v21 = vpop.eup %2459 }
 0x257   :  { %v368_v23 = vmul.f32 %v2460_v21, %v2011_v4  ;;  %v2462_v25 = vpop.eup %2461 }
 0x258   :  { %v2464_v28 = vpop.eup %2463  ;;  %v369_v29 = vmul.f32 %v2462_v25, %v2014_v3 }
 0x259   :  { %v3448_v26 = vpack.c.bf16 %v368_v23, %v367_v22  ;;  %v370_v30 = vmul.f32 %v2464_v28, %v2015_v5 }
 0x25b   :  { %2122 = vmatmul.mubr.msk.bf16.vlgmr.msra.gmra.mrb[0].mxu0 %vm346_vm0, %v3448_v26  ;;  %v3454_v31 = vpack.c.bf16 %v370_v30, %v369_v29 }
 0x25c   :  { %2126 = vmatpush3.bf16.msra.mxu0 %v2384_v24  ;;  %2127 = vmatprep.mubr.msk.bf16.mxu0 %vm3003_vm1, %v3002_v11 }
 0x25d   :  { %2131 = vmatprep.subr.bf16.mxu0 %v2385_v27 }
 0x263   :  { %2128 = vmatmul.mubr.msk.bf16.vlgmr.msra.gmra.mrb[4].mxu0 %vm346_vm0, %v3454_v31 }
 0x264   :  { %2132 = vmatpush3.bf16.msra.mxu0 %v2385_v27  ;;  %2147 = vmatprep.mubr.bf16.mxu0 %v2383_v10 }
 0x265   :  { %2133 = vmatprep.subr.bf16.mxu0 %v2386_v32 }
 0x268   :  { %2134 = vmatpush3.bf16.msra.mxu0 %v2386_v32 }
 0x269   :  { %2135 = vmatprep.subr.bf16.mxu0 %v2387_v33 }
 0x26c   :  { %2136 = vmatpush3.bf16.msra.mxu0 %v2387_v33 }
 0x26d   :  { %2137 = vmatprep.subr.bf16.mxu0 %v2388_v34 }
 0x270   :  { %2138 = vmatpush3.bf16.msra.mxu0 %v2388_v34 }
 0x271   :  { %2139 = vmatprep.subr.bf16.mxu0 %v2389_v35 }
 0x274   :  { %2140 = vmatpush3.bf16.msra.mxu0 %v2389_v35 }
 0x275   :  { %2141 = vmatprep.subr.bf16.mxu0 %v2390_v36 }
 0x278   :  { %2142 = vmatpush3.bf16.msra.mxu0 %v2390_v36 }
 0x279   :  { %2143 = vmatprep.subr.bf16.mxu0 %v2391_v37 }
 0x27c   :  { %2144 = vmatpush3.bf16.msra.mxu0 %v2391_v37  ;;  %v752_v37 = vlaneseq }
 0x27d   :  { %2145 = vmatprep.subr.bf16.mxu0 %v2392_v38 }
 0x280   :  { %2146 = vmatpush3.bf16.msra.mxu0 %v2392_v38  ;;  %v753_v38 = vshrl.u32 %v752_v37, 7 }
 0x281   :  { %2151 = vmatprep.subr.bf16.mxu0 %v2393_v39 }
 0x283   :  { %2148 = vmatmul.mubr.bf16.vlgmr.msra.gmra.mrb[8].mxu0 %v2384_v24 }
 0x284   :  { %2152 = vmatpush3.bf16.msra.mxu0 %v2393_v39  ;;  %v406_v39 = vld [vmem:[#allocation11] sm:$0x1] }
 0x285   :  { %2153 = vmatprep.subr.bf16.mxu0 %v2394_v40 }
 0x288   :  { %2154 = vmatpush3.bf16.msra.mxu0 %v2394_v40  ;;  %v3461_v40 = vsub.s32 0, %v753_v38 }
 0x289   :  { %2155 = vmatprep.subr.bf16.mxu0 %v2395_v41 }
 0x28c   :  { %2156 = vmatpush3.bf16.msra.mxu0 %v2395_v41 }
 0x28d   :  { %2157 = vmatprep.subr.bf16.mxu0 %v2396_v42 }
 0x290   :  { %2158 = vmatpush3.bf16.msra.mxu0 %v2396_v42 }
 0x291   :  { %2159 = vmatprep.subr.bf16.mxu0 %v2397_v43 }
 0x294   :  { %2160 = vmatpush3.bf16.msra.mxu0 %v2397_v43  ;;  %v407_v43 = vld [vmem:[#allocation13] sm:$0x1] }
 0x295   :  { %2161 = vmatprep.subr.bf16.mxu0 %v2398_v44 }
 0x298   :  { %2162 = vmatpush3.bf16.msra.mxu0 %v2398_v44 }
 0x299   :  { %2163 = vmatprep.subr.bf16.mxu0 %v2399_v45 }
 0x29c   :  { %2164 = vmatpush3.bf16.msra.mxu0 %v2399_v45 }
 0x29d   :  { %2165 = vmatprep.subr.bf16.mxu0 %v2400_v46 }
 0x2a0   :  { %2166 = vmatpush3.bf16.msra.mxu0 %v2400_v46 }
 0x2a1   :  { %2171 = vmatprep.subr.bf16.mxu0 %v3002_v11 }
 0x32e   :  { %v451_v47 = vpop.f32.mrb[0].mxu0 }
 0x32f   :  { %v2123_v48 = vpop.f32.mrb[1].mxu0 }
 0x330   :  { %v454_v49 = vpop.f32.mrb[2].mxu0 }
 0x331   :  { %v508_v50 = vpack.c.bf16 %v454_v49, %v451_v47  ;;  %v2124_v51 = vpop.f32.mrb[3].mxu0 }
 0x333   :  { %2167 = vmatprep.mubr.bf16.mxu0 %v508_v50 }
 0x336   :  { %v501_v52 = vpop.f32.mrb[4].mxu0 }
 0x337   :  { %v2129_v53 = vpop.f32.mrb[5].mxu0 }
 0x338   :  { %v504_v54 = vpop.f32.mrb[6].mxu0 }
 0x339   :  { %v509_v55 = vpack.c.bf16 %v504_v54, %v501_v52  ;;  %v2130_v56 = vpop.f32.mrb[7].mxu0 }
 0x33a   :  { %v2401_v56 = vld [vmem:[#allocation16] sm:$0xff]  }
 0x33b   :  { %2168 = vmatmul.mubr.bf16.vlgmr.msra.gmra.mrb[8].mxu0 %v509_v55 }
 0x33c   :  { %2173 = vmatprep.mubr.msk.bf16.mxu0 %vm3003_vm1, %v3002_v11 }
 0x40e   :  { %v2169_v58 = vpop.f32.mrb[8].mxu0 }
 0x40f   :  { %v689_v59 = vpop.f32.mrb[9].mxu0  ;;  %v712_v60 = vadd.f32 %v2169_v58, %v1944_v57 }
 0x410   :  { %v710_v61 = vadd.f32 %v1944_v57, %v689_v59  ;;  %v2170_v62 = vpop.f32.mrb[10].mxu0  ;;  %v2402_v59 = vld [vmem:[#allocation16 + $0x8] sm:$0xff]  }
 0x411   :  { %v692_v63 = vpop.f32.mrb[11].mxu0  ;;  %v713_v1 = vadd.f32 %v2170_v62, %v1944_v57  ;;  %v716_v3 = vmax.f32 %v712_v60, 0.0  ;;  %v2403_v60 = vld [vmem:[#allocation16 + $0x10] sm:$0xff]   ;;  %v2405_v62 = vld [vmem:[#allocation16 + $0x20] sm:$0xff]  }
 0x412   :  { %v714_v0 = vmax.f32 %v710_v61, 0.0  ;;  %v711_v2 = vadd.f32 %v1944_v57, %v692_v63  ;;  %v2404_v61 = vld [vmem:[#allocation16 + $0x18] sm:$0xff]   ;;  %v2406_v63 = vld [vmem:[#allocation16 + $0x28] sm:$0xff]  }
 0x413   :  { %v717_v6 = vmax.f32 %v713_v1, 0.0  ;;  %v731_v9 = vmul.f32 %v716_v3, %v716_v3  ;;  %v2408_v1 = vld [vmem:[#allocation16 + $0x38] sm:$0xff]  }
 0x414   :  { %v715_v4 = vmax.f32 %v711_v2, 0.0  ;;  %v729_v5 = vmul.f32 %v714_v0, %v714_v0  ;;  %v2409_v2 = vld [vmem:[#allocation14] sm:$0xff]  }
 0x415   :  { %v732_v13 = vmul.f32 %v717_v6, %v717_v6 }
 0x416   :  { %v718_v7 = vadd.f32 %v715_v4, %v714_v0  ;;  %v730_v8 = vmul.f32 %v715_v4, %v715_v4 }
 0x418   :  { %v719_v10 = vadd.f32 %v718_v7, %v716_v3  ;;  %v733_v12 = vadd.f32 %v730_v8, %v729_v5  ;;  %v2412_v5 = vld [vmem:[#allocation14 + $0x18] sm:$0xff]   ;;  %v2414_v7 = vld [vmem:[#allocation14 + $0x28] sm:$0xff]   ;;  %v2415_v8 = vld [vmem:[#allocation14 + $0x30] sm:$0xff]  }
 0x41a   :  { %v720_v14 = vadd.f32 %v719_v10, %v717_v6  ;;  %v734_v15 = vadd.f32 %v733_v12, %v731_v9  ;;  %v2416_v9 = vld [vmem:[#allocation14 + $0x38] sm:$0xff]  }
 0x41c   :  { %v721_v16 = vrot.slane %v720_v14, 4  ;;  %v735_v17 = vadd.f32 %v734_v15, %v732_v13 }
 0x41e   :  { %v722_v18 = vadd.f32 %v721_v16, %v720_v14  ;;  %v736_v19 = vrot.slane %v735_v17, 4 }
 0x420   :  { %v723_v20 = vrot.slane %v722_v18, 2  ;;  %v737_v21 = vadd.f32 %v736_v19, %v735_v17 }
 0x422   :  { %v724_v22 = vadd.f32 %v723_v20, %v722_v18  ;;  %v738_v23 = vrot.slane %v737_v21, 2 }
 0x424   :  { %v725_v24 = vrot.slane %v724_v22, 1  ;;  %v739_v25 = vadd.f32 %v738_v23, %v737_v21  ;;  %v2417_v21 = vld [vmem:[#allocation31] sm:$0xff]   ;;  %v2419_v23 = vld [vmem:[#allocation31 + $0x10] sm:$0xff]  }
 0x426   :  { %v726_v27 = vadd.f32 %v725_v24, %v724_v22  ;;  %v740_v28 = vrot.slane %v739_v25, 1  ;;  %v2418_v22 = vld [vmem:[#allocation31 + $0x8] sm:$0xff]   ;;  %v2420_v24 = vld [vmem:[#allocation31 + $0x18] sm:$0xff]  }
 0x428   :  { %v728_v29 = vmul.f32 0.03125, %v726_v27  ;;  %v741_v30 = vadd.f32 %v740_v28, %v739_v25  ;;  %v2421_v25 = vld [vmem:[#allocation31 + $0x20] sm:$0xff]   ;;  %v2422_v27 = vld [vmem:[#allocation31 + $0x28] sm:$0xff]   ;;  %v2423_v28 = vld [vmem:[#allocation31 + $0x30] sm:$0xff]  }
 0x42a   :  { %v742_v32 = vmul.f32 0.03125, %v741_v30  ;;  %v743_v33 = vmul.f32 %v728_v29, %v728_v29  ;;  %v3480_v30 = vld [vmem:[#allocation29] sm:$0xff]  }
 0x42c   :  { %v744_v34 = vsub.f32 %v742_v32, %v743_v33  ;;  %v1963_v32 = vld [vmem:[#allocation17] ss:$0 sm:$0xff] }
 0x42e   :  { %v745_v35 = vmax.f32 %v744_v34, 0.0 }
 0x430   :  { %v746_v36 = vadd.f32 1e-05, %v745_v35 }
 0x432   :  { %2465 = vrsqrt.f32 %v746_v36 }
 0x43c   :  { %v2466_v41 = vpop.eup %2465 }
 0x43d   :  { %v748_v42 = vmul.f32 %v2466_v41, %v406_v39 }
 0x43f   :  { %v749_v44 = vmul.f32 %v748_v42, %v728_v29  ;;  %v755_v45 = vrot.slane %v748_v42, %v3461_v40  ;;  %v2424_v29 = vld [vmem:[#allocation31 + $0x38] sm:$0xff]  }
 0x441   :  { %v750_v46 = vsub.f32 %v407_v43, %v749_v44  ;;  %v758_v47 = vmul.f32 %v755_v45, %v715_v4  ;;  %v757_v48 = vmul.f32 %v755_v45, %v714_v0  ;;  %v759_v49 = vmul.f32 %v755_v45, %v716_v3  ;;  %v2407_v0 = vld [vmem:[#allocation16 + $0x30] sm:$0xff]   ;;  %v2410_v3 = vld [vmem:[#allocation14 + $0x8] sm:$0xff]  }
 0x442   :  { %v760_v50 = vmul.f32 %v755_v45, %v717_v6  ;;  %v2411_v4 = vld [vmem:[#allocation14 + $0x10] sm:$0xff]   ;;  %v2413_v6 = vld [vmem:[#allocation14 + $0x20] sm:$0xff]  }
 0x443   :  { %v765_v51 = vrot.slane %v750_v46, %v3461_v40 }
 0x445   :  { %v768_v52 = vadd.f32 %v765_v51, %v758_v47  ;;  %v767_v53 = vadd.f32 %v765_v51, %v757_v48  ;;  %v769_v54 = vadd.f32 %v765_v51, %v759_v49  ;;  %v770_v55 = vadd.f32 %v765_v51, %v760_v50 }
 0x447   :  { %v3465_v57 = vpack.c.bf16 %v768_v52, %v767_v53  ;;  %v3467_v58 = vpack.c.bf16 %v770_v55, %v769_v54 }
 0x449   :  { %2172 = vmatpush3.bf16.msra.mxu0 %v3465_v57  ;;  %2178 = vmatpush3.bf16.msra.mxu1 %v3467_v58 }
 0x44a   :  { %2183 = vmatprep.subr.bf16.mxu1 %v2401_v56  ;;  %2223 = vmatprep.subr.bf16.mxu0 %v3002_v11 }
 0x44c   :  { %2174 = vmatmul.mubr.msk.bf16.vlgmr.msra.gmra.mrb[12].mxu0 %vm346_vm0, %v3448_v26  ;;  %2180 = vmatmul.mubr.msk.bf16.vlgmr.msra.gmra.mrb[0].mxu1 %vm346_vm0, %v3454_v31 }
 0x44d   :  { %2184 = vmatpush3.bf16.msra.mxu1 %v2401_v56  ;;  %2199 = vmatprep.mubr.bf16.mxu1 %v3465_v57 }
 0x44e   :  { %2185 = vmatprep.subr.bf16.mxu1 %v2402_v59  ;;  %2225 = vmatprep.mubr.msk.bf16.mxu0 %vm3003_vm1, %v3002_v11 }
 0x451   :  { %2186 = vmatpush3.bf16.msra.mxu1 %v2402_v59 }
 0x452   :  { %2187 = vmatprep.subr.bf16.mxu1 %v2403_v60 }
 0x455   :  { %2188 = vmatpush3.bf16.msra.mxu1 %v2403_v60 }
 0x456   :  { %2189 = vmatprep.subr.bf16.mxu1 %v2404_v61 }
 0x459   :  { %2190 = vmatpush3.bf16.msra.mxu1 %v2404_v61 }
 0x45a   :  { %2191 = vmatprep.subr.bf16.mxu1 %v2405_v62 }
 0x45d   :  { %2192 = vmatpush3.bf16.msra.mxu1 %v2405_v62 }
 0x45e   :  { %2193 = vmatprep.subr.bf16.mxu1 %v2406_v63 }
 0x461   :  { %2194 = vmatpush3.bf16.msra.mxu1 %v2406_v63 }
 0x462   :  { %2195 = vmatprep.subr.bf16.mxu1 %v2407_v0 }
 0x465   :  { %2196 = vmatpush3.bf16.msra.mxu1 %v2407_v0 }
 0x466   :  { %2197 = vmatprep.subr.bf16.mxu1 %v2408_v1 }
 0x469   :  { %2198 = vmatpush3.bf16.msra.mxu1 %v2408_v1 }
 0x46a   :  { %2203 = vmatprep.subr.bf16.mxu1 %v2409_v2 }
 0x46c   :  { %2200 = vmatmul.mubr.bf16.vlgmr.msra.gmra.mrb[4].mxu1 %v3467_v58 }
 0x46d   :  { %2204 = vmatpush3.bf16.msra.mxu1 %v2409_v2 }
 0x46e   :  { %2205 = vmatprep.subr.bf16.mxu1 %v2410_v3 }
 0x471   :  { %2206 = vmatpush3.bf16.msra.mxu1 %v2410_v3 }
 0x472   :  { %2207 = vmatprep.subr.bf16.mxu1 %v2411_v4 }
 0x475   :  { %2208 = vmatpush3.bf16.msra.mxu1 %v2411_v4 }
 0x476   :  { %2209 = vmatprep.subr.bf16.mxu1 %v2412_v5 }
 0x479   :  { %2210 = vmatpush3.bf16.msra.mxu1 %v2412_v5 }
 0x47a   :  { %2211 = vmatprep.subr.bf16.mxu1 %v2413_v6 }
 0x47d   :  { %2212 = vmatpush3.bf16.msra.mxu1 %v2413_v6 }
 0x47e   :  { %2213 = vmatprep.subr.bf16.mxu1 %v2414_v7 }
 0x481   :  { %2214 = vmatpush3.bf16.msra.mxu1 %v2414_v7 }
 0x482   :  { %2215 = vmatprep.subr.bf16.mxu1 %v2415_v8 }
 0x485   :  { %2216 = vmatpush3.bf16.msra.mxu1 %v2415_v8 }
 0x486   :  { %2217 = vmatprep.subr.bf16.mxu1 %v2416_v9 }
 0x489   :  { %2218 = vmatpush3.bf16.msra.mxu1 %v2416_v9 }
 0x48a   :  { %2275 = vmatprep.subr.bf16.mxu1 %v2417_v21 }
 0x51f   :  { %v842_v10 = vpop.f32.mrb[12].mxu0  ;;  %v883_v12 = vpop.f32.mrb[0].mxu1 }
 0x520   :  { %v2175_v13 = vpop.f32.mrb[13].mxu0  ;;  %v2181_v14 = vpop.f32.mrb[1].mxu1 }
 0x521   :  { %v845_v15 = vpop.f32.mrb[14].mxu0  ;;  %v886_v16 = vpop.f32.mrb[2].mxu1  ;;  %v806_v13 = vld [vmem:[#allocation19] sm:$0x1] }
 0x522   :  { %v890_v17 = vpack.c.bf16 %v845_v15, %v842_v10  ;;  %v891_v18 = vpack.c.bf16 %v886_v16, %v883_v12  ;;  %v2176_v19 = vpop.f32.mrb[15].mxu0  ;;  %v2182_v20 = vpop.f32.mrb[3].mxu1  ;;  %v807_v16 = vld [vmem:[#allocation20] sm:$0x1] }
 0x524   :  { %2219 = vmatprep.mubr.bf16.mxu1 %v890_v17 }
 0x525   :  { %2220 = vmatmul.mubr.bf16.vlgmr.msra.gmra.mrb[4].mxu1 %v891_v18 }
 0x526   :  { %2276 = vmatpush3.bf16.msra.mxu1 %v2417_v21 }
 0x527   :  { %2277 = vmatprep.subr.bf16.mxu1 %v2418_v22 }
 0x52a   :  { %2278 = vmatpush3.bf16.msra.mxu1 %v2418_v22 }
 0x52b   :  { %2279 = vmatprep.subr.bf16.mxu1 %v2419_v23 }
 0x52e   :  { %2280 = vmatpush3.bf16.msra.mxu1 %v2419_v23 }
 0x52f   :  { %2281 = vmatprep.subr.bf16.mxu1 %v2420_v24 }
 0x532   :  { %2282 = vmatpush3.bf16.msra.mxu1 %v2420_v24 }
 0x533   :  { %2283 = vmatprep.subr.bf16.mxu1 %v2421_v25 }
 0x536   :  { %2284 = vmatpush3.bf16.msra.mxu1 %v2421_v25 }
 0x537   :  { %2285 = vmatprep.subr.bf16.mxu1 %v2422_v27 }
 0x53a   :  { %2286 = vmatpush3.bf16.msra.mxu1 %v2422_v27 }
 0x53b   :  { %2287 = vmatprep.subr.bf16.mxu1 %v2423_v28 }
 0x53e   :  { %2288 = vmatpush3.bf16.msra.mxu1 %v2423_v28 }
 0x53f   :  { %2289 = vmatprep.subr.bf16.mxu1 %v2424_v29 }
 0x542   :  { %2290 = vmatpush3.bf16.msra.mxu1 %v2424_v29 }
 0x543   :  { %2295 = vmatprep.subr.bf16.mxu1 %v3480_v30 }
 0x5f8   :  { %v2221_v33 = vpop.f32.mrb[4].mxu1 }
 0x5f9   :  { %v1071_v34 = vpop.f32.mrb[5].mxu1  ;;  %v1094_v35 = vadd.f32 %v2221_v33, %v1963_v32 }
 0x5fa   :  { %v1092_v36 = vadd.f32 %v1963_v32, %v1071_v34  ;;  %v2222_v37 = vpop.f32.mrb[6].mxu1  ;;  %v2426_v34 = vld [vmem:[#allocation29 + $0x8] sm:$0xff]  }
 0x5fb   :  { %v1074_v38 = vpop.f32.mrb[7].mxu1  ;;  %v1095_v41 = vadd.f32 %v2222_v37, %v1963_v32  ;;  %v1098_v43 = vmax.f32 %v1094_v35, 0.0  ;;  %v2428_v35 = vld [vmem:[#allocation23] sm:$0xff]  }
 0x5fc   :  { %v1096_v39 = vmax.f32 %v1092_v36, 0.0  ;;  %v1093_v42 = vadd.f32 %v1963_v32, %v1074_v38  ;;  %v2427_v36 = vld [vmem:[#allocation29 + $0x10] sm:$0xff]   ;;  %v2429_v37 = vld [vmem:[#allocation29 + $0x18] sm:$0xff]   ;;  %v2430_v38 = vld [vmem:[#allocation23 + $0x8] sm:$0xff]  }
 0x5fd   :  { %v1099_v46 = vmax.f32 %v1095_v41, 0.0  ;;  %v1112_v49 = vmul.f32 %v1098_v43, %v1098_v43  ;;  %v2436_v41 = vld [vmem:[#allocation23 + $0x20] sm:$0xff]  }
 0x5fe   :  { %v1097_v44 = vmax.f32 %v1093_v42, 0.0  ;;  %v1110_v45 = vmul.f32 %v1096_v39, %v1096_v39  ;;  %v2438_v42 = vld [vmem:[#allocation23 + $0x28] sm:$0xff]  }
 0x5ff   :  { %v1113_v52 = vmul.f32 %v1099_v46, %v1099_v46 }
 0x600   :  { %v1100_v47 = vadd.f32 %v1097_v44, %v1096_v39  ;;  %v1111_v48 = vmul.f32 %v1097_v44, %v1097_v44 }
 0x602   :  { %v1101_v50 = vadd.f32 %v1100_v47, %v1098_v43  ;;  %v1114_v51 = vadd.f32 %v1111_v48, %v1110_v45  ;;  %v2441_v45 = vld [vmem:[#allocation22] sm:$0xff]   ;;  %v2443_v47 = vld [vmem:[#allocation22 + $0x10] sm:$0xff]   ;;  %v2444_v48 = vld [vmem:[#allocation22 + $0x18] sm:$0xff]  }
 0x604   :  { %v1102_v53 = vadd.f32 %v1101_v50, %v1099_v46  ;;  %v1115_v54 = vadd.f32 %v1114_v51, %v1112_v49  ;;  %v2445_v49 = vld [vmem:[#allocation22 + $0x20] sm:$0xff]   ;;  %v2447_v50 = vld [vmem:[#allocation22 + $0x30] sm:$0xff]   ;;  %v2448_v51 = vld [vmem:[#allocation22 + $0x38] sm:$0xff]  }
 0x606   :  { %v1103_v55 = vrot.slane %v1102_v53, 4  ;;  %v1116_v56 = vadd.f32 %v1115_v54, %v1113_v52 }
 0x608   :  { %v1104_v59 = vadd.f32 %v1103_v55, %v1102_v53  ;;  %v1117_v60 = vrot.slane %v1116_v56, 4 }
 0x60a   :  { %v1105_v61 = vrot.slane %v1104_v59, 2  ;;  %v1118_v62 = vadd.f32 %v1117_v60, %v1116_v56 }
 0x60c   :  { %v1106_v63 = vadd.f32 %v1105_v61, %v1104_v59  ;;  %v1119_v0 = vrot.slane %v1118_v62, 2 }
 0x60e   :  { %v1107_v1 = vrot.slane %v1106_v63, 1  ;;  %v1120_v2 = vadd.f32 %v1119_v0, %v1118_v62  ;;  %v2449_v0 = vld [vmem:[#allocation32] sm:$0xff]  }
 0x610   :  { %v1108_v3 = vadd.f32 %v1107_v1, %v1106_v63  ;;  %v1121_v4 = vrot.slane %v1120_v2, 1  ;;  %v2450_v1 = vld [vmem:[#allocation32 + $0x8] sm:$0xff]  }
 0x612   :  { %v1109_v5 = vmul.f32 0.03125, %v1108_v3  ;;  %v1122_v6 = vadd.f32 %v1121_v4, %v1120_v2  ;;  %v2451_v2 = vld [vmem:[#allocation32 + $0x10] sm:$0xff]   ;;  %v2452_v3 = vld [vmem:[#allocation32 + $0x18] sm:$0xff]   ;;  %v2453_v4 = vld [vmem:[#allocation32 + $0x20] sm:$0xff]  }
 0x614   :  { %v1123_v7 = vmul.f32 0.03125, %v1122_v6  ;;  %v1124_v8 = vmul.f32 %v1109_v5, %v1109_v5  ;;  %v2455_v6 = vld [vmem:[#allocation32 + $0x30] sm:$0xff]  }
 0x616   :  { %v1125_v9 = vsub.f32 %v1123_v7, %v1124_v8  ;;  %v2456_v7 = vld [vmem:[#allocation32 + $0x38] sm:$0xff]  }
 0x617   :  { %v1982_v8 = vld [vmem:[#allocation25] ss:$0 sm:$0xff] }
 0x618   :  { %v1126_v10 = vmax.f32 %v1125_v9, 0.0 }
 0x61a   :  { %v1127_v12 = vadd.f32 1e-05, %v1126_v10 }
 0x61c   :  { %2467 = vrsqrt.f32 %v1127_v12 }
 0x626   :  { %v2468_v14 = vpop.eup %2467 }
 0x627   :  { %v1129_v15 = vmul.f32 %v2468_v14, %v806_v13 }
 0x629   :  { %v1130_v17 = vmul.f32 %v1129_v15, %v1109_v5  ;;  %v1136_v18 = vrot.slane %v1129_v15, %v3461_v40  ;;  %v2454_v5 = vld [vmem:[#allocation32 + $0x28] sm:$0xff]  }
 0x62b   :  { %v1131_v19 = vsub.f32 %v807_v16, %v1130_v17  ;;  %v1139_v20 = vmul.f32 %v1136_v18, %v1097_v44  ;;  %v1138_v21 = vmul.f32 %v1136_v18, %v1096_v39  ;;  %v1140_v22 = vmul.f32 %v1136_v18, %v1098_v43  ;;  %v2435_v39 = vld [vmem:[#allocation29 + $0x30] sm:$0xff]  }
 0x62c   :  { %v1141_v23 = vmul.f32 %v1136_v18, %v1099_v46  ;;  %v2439_v43 = vld [vmem:[#allocation23 + $0x30] sm:$0xff]   ;;  %v2440_v44 = vld [vmem:[#allocation23 + $0x38] sm:$0xff]   ;;  %v2442_v46 = vld [vmem:[#allocation22 + $0x8] sm:$0xff]  }
 0x62d   :  { %v1146_v24 = vrot.slane %v1131_v19, %v3461_v40 }
 0x62f   :  { %v1149_v25 = vadd.f32 %v1146_v24, %v1139_v20  ;;  %v1148_v27 = vadd.f32 %v1146_v24, %v1138_v21  ;;  %v1150_v28 = vadd.f32 %v1146_v24, %v1140_v22  ;;  %v1151_v29 = vadd.f32 %v1146_v24, %v1141_v23 }
 0x631   :  { %v1152_v32 = vpack.c.bf16 %v1149_v25, %v1148_v27  ;;  %v1153_v33 = vpack.c.bf16 %v1151_v29, %v1150_v28 }
 0x633   :  { %2224 = vmatpush3.bf16.msra.mxu0 %v1152_v32  ;;  %2291 = vmatprep.mubr.bf16.mxu1 %v1152_v32 }
 0x634   :  { %2292 = vmatmul.mubr.bf16.vlgmr.msra.gmra.mrb[8].mxu1 %v1153_v33  ;;  %2229 = vmatprep.subr.bf16.mxu0 %v3002_v11 }
 0x635   :  { %2296 = vmatpush3.bf16.msra.mxu1 %v3480_v30  ;;  %2311 = vmatprep.mubr.bf16.mxu1 %v3465_v57  ;;  %v2431_v57 = vld [vmem:[#allocation29 + $0x20] sm:$0xff]   ;;  %v2433_v30 = vld [vmem:[#allocation29 + $0x28] sm:$0xff]  }
 0x636   :  { %2226 = vmatmul.mubr.msk.bf16.vlgmr.msra.gmra.mrb[16].mxu0 %vm346_vm0, %v3448_v26  ;;  %2297 = vmatprep.subr.bf16.mxu1 %v2426_v34  ;;  %v2432_v26 = vld [vmem:[#allocation23 + $0x10] sm:$0xff]  }
 0x637   :  { %2230 = vmatpush3.bf16.msra.mxu0 %v1153_v33  ;;  %2231 = vmatprep.mubr.msk.bf16.mxu0 %vm3003_vm1, %v3002_v11  ;;  %v2434_v11 = vld [vmem:[#allocation23 + $0x18] sm:$0xff]  }
 0x638   :  { %2235 = vmatprep.subr.bf16.mxu0 %v2428_v35 }
 0x639   :  { %2298 = vmatpush3.bf16.msra.mxu1 %v2426_v34 }
 0x63a   :  { %2299 = vmatprep.subr.bf16.mxu1 %v2427_v36 }
 0x63d   :  { %2300 = vmatpush3.bf16.msra.mxu1 %v2427_v36 }
 0x63e   :  { %2232 = vmatmul.mubr.msk.bf16.vlgmr.msra.gmra.mrb[20].mxu0 %vm346_vm0, %v3454_v31  ;;  %2301 = vmatprep.subr.bf16.mxu1 %v2429_v37  ;;  %v2437_v31 = vld [vmem:[#allocation29 + $0x38] sm:$0xff]  }
 0x63f   :  { %2236 = vmatpush3.bf16.msra.mxu0 %v2428_v35  ;;  %2251 = vmatprep.mubr.bf16.mxu0 %v1152_v32 }
 0x640   :  { %2237 = vmatprep.subr.bf16.mxu0 %v2430_v38 }
 0x641   :  { %2302 = vmatpush3.bf16.msra.mxu1 %v2429_v37 }
 0x642   :  { %2303 = vmatprep.subr.bf16.mxu1 %v2431_v57 }
 0x643   :  { %2238 = vmatpush3.bf16.msra.mxu0 %v2430_v38 }
 0x644   :  { %2239 = vmatprep.subr.bf16.mxu0 %v2432_v26 }
 0x645   :  { %2304 = vmatpush3.bf16.msra.mxu1 %v2431_v57 }
 0x646   :  { %2305 = vmatprep.subr.bf16.mxu1 %v2433_v30 }
 0x647   :  { %2240 = vmatpush3.bf16.msra.mxu0 %v2432_v26 }
 0x648   :  { %2241 = vmatprep.subr.bf16.mxu0 %v2434_v11 }
 0x649   :  { %2306 = vmatpush3.bf16.msra.mxu1 %v2433_v30 }
 0x64a   :  { %2307 = vmatprep.subr.bf16.mxu1 %v2435_v39 }
 0x64b   :  { %2242 = vmatpush3.bf16.msra.mxu0 %v2434_v11 }
 0x64c   :  { %2243 = vmatprep.subr.bf16.mxu0 %v2436_v41 }
 0x64d   :  { %2308 = vmatpush3.bf16.msra.mxu1 %v2435_v39 }
 0x64e   :  { %2309 = vmatprep.subr.bf16.mxu1 %v2437_v31 }
 0x64f   :  { %2244 = vmatpush3.bf16.msra.mxu0 %v2436_v41 }
 0x650   :  { %2245 = vmatprep.subr.bf16.mxu0 %v2438_v42 }
 0x651   :  { %2310 = vmatpush3.bf16.msra.mxu1 %v2437_v31 }
 0x652   :  { %2315 = vmatprep.subr.bf16.mxu1 %v2449_v0 }
 0x653   :  { %2246 = vmatpush3.bf16.msra.mxu0 %v2438_v42 }
 0x654   :  { %2312 = vmatmul.mubr.bf16.vlgmr.msra.gmra.mrb[8].mxu1 %v3467_v58  ;;  %2247 = vmatprep.subr.bf16.mxu0 %v2439_v43  ;;  %v2446_v58 = vld [vmem:[#allocation22 + $0x28] sm:$0xff]  }
 0x655   :  { %2316 = vmatpush3.bf16.msra.mxu1 %v2449_v0 }
 0x656   :  { %2317 = vmatprep.subr.bf16.mxu1 %v2450_v1 }
 0x657   :  { %2248 = vmatpush3.bf16.msra.mxu0 %v2439_v43 }
 0x658   :  { %2249 = vmatprep.subr.bf16.mxu0 %v2440_v44 }
 0x659   :  { %2318 = vmatpush3.bf16.msra.mxu1 %v2450_v1 }
 0x65a   :  { %2319 = vmatprep.subr.bf16.mxu1 %v2451_v2 }
 0x65b   :  { %2250 = vmatpush3.bf16.msra.mxu0 %v2440_v44 }
 0x65c   :  { %2255 = vmatprep.subr.bf16.mxu0 %v2441_v45 }
 0x65d   :  { %2320 = vmatpush3.bf16.msra.mxu1 %v2451_v2 }
 0x65e   :  { %2252 = vmatmul.mubr.bf16.vlgmr.msra.gmra.mrb[24].mxu0 %v1153_v33  ;;  %2321 = vmatprep.subr.bf16.mxu1 %v2452_v3 }
 0x65f   :  { %2256 = vmatpush3.bf16.msra.mxu0 %v2441_v45 }
 0x660   :  { %2257 = vmatprep.subr.bf16.mxu0 %v2442_v46 }
 0x661   :  { %2322 = vmatpush3.bf16.msra.mxu1 %v2452_v3 }
 0x662   :  { %2323 = vmatprep.subr.bf16.mxu1 %v2453_v4 }
 0x663   :  { %2258 = vmatpush3.bf16.msra.mxu0 %v2442_v46 }
 0x664   :  { %2259 = vmatprep.subr.bf16.mxu0 %v2443_v47 }
 0x665   :  { %2324 = vmatpush3.bf16.msra.mxu1 %v2453_v4  ;;  %v2007_v4 = vld [vmem:[#allocation34] ss:$0 sm:$0xff] }
 0x666   :  { %2325 = vmatprep.subr.bf16.mxu1 %v2454_v5 }
 0x667   :  { %2260 = vmatpush3.bf16.msra.mxu0 %v2443_v47 }
 0x668   :  { %2261 = vmatprep.subr.bf16.mxu0 %v2444_v48 }
 0x669   :  { %2326 = vmatpush3.bf16.msra.mxu1 %v2454_v5 }
 0x66a   :  { %2327 = vmatprep.subr.bf16.mxu1 %v2455_v6 }
 0x66b   :  { %2262 = vmatpush3.bf16.msra.mxu0 %v2444_v48 }
 0x66c   :  { %2263 = vmatprep.subr.bf16.mxu0 %v2445_v49 }
 0x66d   :  { %2328 = vmatpush3.bf16.msra.mxu1 %v2455_v6 }
 0x66e   :  { %2329 = vmatprep.subr.bf16.mxu1 %v2456_v7 }
 0x66f   :  { %2264 = vmatpush3.bf16.msra.mxu0 %v2445_v49  ;;  %v1187_v49 = vld [vmem:[#allocation26] sm:$0x1] }
 0x670   :  { %2265 = vmatprep.subr.bf16.mxu0 %v2446_v58 }
 0x671   :  { %2330 = vmatpush3.bf16.msra.mxu1 %v2456_v7 }
 0x673   :  { %2266 = vmatpush3.bf16.msra.mxu0 %v2446_v58 }
 0x674   :  { %2267 = vmatprep.subr.bf16.mxu0 %v2447_v50 }
 0x677   :  { %2268 = vmatpush3.bf16.msra.mxu0 %v2447_v50 }
 0x678   :  { %2269 = vmatprep.subr.bf16.mxu0 %v2448_v51 }
 0x67b   :  { %2270 = vmatpush3.bf16.msra.mxu0 %v2448_v51  ;;  %v1188_v51 = vld [vmem:[#allocation28] sm:$0x1] }
 0x709   :  { %v1223_v52 = vpop.f32.mrb[16].mxu0 }
 0x70a   :  { %v2227_v53 = vpop.f32.mrb[17].mxu0 }
 0x70b   :  { %v1226_v54 = vpop.f32.mrb[18].mxu0 }
 0x70c   :  { %v1271_v55 = vpack.c.bf16 %v1226_v54, %v1223_v52  ;;  %v2228_v56 = vpop.f32.mrb[19].mxu0 }
 0x70e   :  { %2271 = vmatprep.mubr.bf16.mxu0 %v1271_v55 }
 0x711   :  { %v1264_v59 = vpop.f32.mrb[20].mxu0 }
 0x712   :  { %v2233_v60 = vpop.f32.mrb[21].mxu0 }
 0x713   :  { %v1267_v61 = vpop.f32.mrb[22].mxu0 }
 0x714   :  { %v1272_v62 = vpack.c.bf16 %v1267_v61, %v1264_v59  ;;  %v2234_v63 = vpop.f32.mrb[23].mxu0 }
 0x716   :  { %2272 = vmatmul.mubr.bf16.vlgmr.msra.gmra.mrb[24].mxu0 %v1272_v62 }
 0x7e9   :  { %v2273_v9 = vpop.f32.mrb[24].mxu0 }
 0x7ea   :  { %v1452_v10 = vpop.f32.mrb[25].mxu0  ;;  %v1475_v12 = vadd.f32 %v2273_v9, %v1982_v8 }
 0x7eb   :  { %v1473_v13 = vadd.f32 %v1982_v8, %v1452_v10  ;;  %v2274_v14 = vpop.f32.mrb[26].mxu0 }
 0x7ec   :  { %v1455_v15 = vpop.f32.mrb[27].mxu0  ;;  %v1476_v17 = vadd.f32 %v2274_v14, %v1982_v8  ;;  %v1479_v19 = vmax.f32 %v1475_v12, 0.0 }
 0x7ed   :  { %v1477_v16 = vmax.f32 %v1473_v13, 0.0  ;;  %v1474_v18 = vadd.f32 %v1982_v8, %v1455_v15 }
 0x7ee   :  { %v1480_v22 = vmax.f32 %v1476_v17, 0.0  ;;  %v1493_v25 = vmul.f32 %v1479_v19, %v1479_v19 }
 0x7ef   :  { %v1478_v20 = vmax.f32 %v1474_v18, 0.0  ;;  %v1491_v21 = vmul.f32 %v1477_v16, %v1477_v16 }
 0x7f0   :  { %v1494_v29 = vmul.f32 %v1480_v22, %v1480_v22 }
 0x7f1   :  { %v1481_v23 = vadd.f32 %v1478_v20, %v1477_v16  ;;  %v1492_v24 = vmul.f32 %v1478_v20, %v1478_v20 }
 0x7f3   :  { %v1482_v27 = vadd.f32 %v1481_v23, %v1479_v19  ;;  %v1495_v28 = vadd.f32 %v1492_v24, %v1491_v21 }
 0x7f5   :  { %v1483_v32 = vadd.f32 %v1482_v27, %v1480_v22  ;;  %v1496_v33 = vadd.f32 %v1495_v28, %v1493_v25 }
 0x7f7   :  { %v1484_v34 = vrot.slane %v1483_v32, 4  ;;  %v1497_v35 = vadd.f32 %v1496_v33, %v1494_v29 }
 0x7f9   :  { %v1485_v36 = vadd.f32 %v1484_v34, %v1483_v32  ;;  %v1498_v37 = vrot.slane %v1497_v35, 4 }
 0x7fb   :  { %v1486_v38 = vrot.slane %v1485_v36, 2  ;;  %v1499_v57 = vadd.f32 %v1498_v37, %v1497_v35 }
 0x7fd   :  { %v1487_v26 = vadd.f32 %v1486_v38, %v1485_v36  ;;  %v1500_v30 = vrot.slane %v1499_v57, 2 }
 0x7ff   :  { %v1488_v11 = vrot.slane %v1487_v26, 1  ;;  %v1501_v39 = vadd.f32 %v1500_v30, %v1499_v57 }
 0x801   :  { %v1489_v41 = vadd.f32 %v1488_v11, %v1487_v26  ;;  %v1502_v31 = vrot.slane %v1501_v39, 1 }
 0x803   :  { %v1490_v42 = vmul.f32 0.03125, %v1489_v41  ;;  %v1503_v43 = vadd.f32 %v1502_v31, %v1501_v39 }
 0x805   :  { %v1504_v44 = vmul.f32 0.03125, %v1503_v43  ;;  %v1505_v45 = vmul.f32 %v1490_v42, %v1490_v42 }
 0x807   :  { %v1506_v46 = vsub.f32 %v1504_v44, %v1505_v45 }
 0x809   :  { %v1507_v47 = vmax.f32 %v1506_v46, 0.0 }
 0x80b   :  { %v1508_v48 = vadd.f32 1e-05, %v1507_v47 }
 0x80d   :  { %2469 = vrsqrt.f32 %v1508_v48 }
 0x817   :  { %v2470_v58 = vpop.eup %2469 }
 0x818   :  { %v1510_v50 = vmul.f32 %v2470_v58, %v1187_v49 }
 0x81a   :  { %v1511_v52 = vmul.f32 %v1510_v50, %v1490_v42  ;;  %v1517_v53 = vrot.slane %v1510_v50, %v3461_v40 }
 0x81c   :  { %v1520_v54 = vmul.f32 %v1517_v53, %v1478_v20  ;;  %v1512_v55 = vsub.f32 %v1188_v51, %v1511_v52  ;;  %v1519_v56 = vmul.f32 %v1517_v53, %v1477_v16  ;;  %v1521_v59 = vmul.f32 %v1517_v53, %v1479_v19 }
 0x81d   :  { %v1522_v60 = vmul.f32 %v1517_v53, %v1480_v22 }
 0x81e   :  { %v1527_v61 = vrot.slane %v1512_v55, %v3461_v40 }
 0x820   :  { %v1529_v62 = vadd.f32 %v1527_v61, %v1519_v56  ;;  %v1530_v63 = vadd.f32 %v1527_v61, %v1520_v54  ;;  %v1531_v0 = vadd.f32 %v1527_v61, %v1521_v59  ;;  %v1532_v1 = vadd.f32 %v1527_v61, %v1522_v60 }
 0x822   :  { %v1533_v2 = vpack.c.bf16 %v1530_v63, %v1529_v62  ;;  %v1534_v3 = vpack.c.bf16 %v1532_v1, %v1531_v0 }
 0x824   :  { %2331 = vmatprep.mubr.bf16.mxu1 %v1533_v2 }
 0x825   :  { %2332 = vmatmul.mubr.bf16.vlgmr.msra.gmra.mrb[8].mxu1 %v1534_v3 }
 0x8f8   :  { %v2333_v5 = vpop.f32.mrb[8].mxu1 }
 0x8f9   :  { %v1887_v6 = vadd.f32 %v2333_v5, %v2007_v4  ;;  %v1859_v7 = vpop.f32.mrb[9].mxu1 }
 0x8fa   :  { %v1885_v8 = vadd.f32 %v2007_v4, %v1859_v7  ;;  %v2334_v9 = vpop.f32.mrb[10].mxu1 }
 0x8fb   :  { %v1891_v10 = vmax.f32 %v1887_v6, 0.0  ;;  %v1888_v12 = vadd.f32 %v2334_v9, %v2007_v4  ;;  %v1862_v13 = vpop.f32.mrb[11].mxu1 }
 0x8fc   :  { %v1889_v40 = vmax.f32 %v1885_v8, 0.0  ;;  %v1886_v14 = vadd.f32 %v2007_v4, %v1862_v13 }
 0x8fd   :  { %1895 = vst [vmem:[#allocation35 + $0x10] sm:$0xff] %v1891_v10  ;;  %v1892_v15 = vmax.f32 %v1888_v12, 0.0 }
 0x8fe   :  { %1893 = vst [vmem:[#allocation35] sm:$0xff] %v1889_v40  ;;  %v1890_v16 = vmax.f32 %v1886_v14, 0.0 }
 0x8ff   :  { %1896 = vst [vmem:[#allocation35 + $0x18] sm:$0xff] %v1892_v15 }
 0x900   :  { %1894 = vst [vmem:[#allocation35 + $0x8] sm:$0xff] %v1890_v16 }
 0x901   :  { %2944 = shalt.err (!%p2941_p4)
}
 0x902   :  { %s3557_s10 = sld [smem:[#allocation56_spill]] }
 0x908   :  { %s2945_s19 = scalar_lea.hbm %s3557_s10, 512 }
 0x909   :  { %p2946_p5 = scmp.ne.s32.totalorder %s3557_s10, %s2945_s19  ;;  %p2949_p6 = scmp.lt.u32.totalorder %s2945_s19, %s3557_s10 }
 0x90b   :  { %p2951_p7 = pnand %p2949_p6, %p2946_p5 }
 0x90d   :  { %2954 = shalt.err (!%p2951_p7)
}
 0x90e   :  { %s3005_s30 = smov 128   ;;  %s3006_s23 = smov 8  }
 0x90f   :  { %1908 = dma.vmem_to_hbm [thread:$0]  %s1903_s13, 512, %s3557_s10, [#allocation4], %s3005_s30, %s3005_s30, %s3006_s23  }
 0x910   :  { %2977 = dma.done.wait [#allocation4], 512  }
 0x911   :  { %2978 = vsyncadd [#allocation4], 4294966784 }
 0x912   :  { %1912 = vsyncpa [#allocation3], 1 }
 0x913   :  { %1913 = vsyncpa [#allocation6], 1 }
 0x914   :  { %1914 = vsyncpa [#allocation9], 1 }
 0x915   :  { %1915 = vsyncpa [#allocation12], 1 }
 0x916   :  { %1916 = vsyncpa [#allocation15], 1 }
 0x917   :  { %1917 = vsyncpa [#allocation18], 1 }
 0x918   :  { %1918 = vsyncpa [#allocation21], 1 }
 0x919   :  { %1919 = vsyncpa [#allocation24], 1 }
 0x91a   :  { %1920 = vsyncpa [#allocation27], 1 }
 0x91b   :  { %1921 = vsyncpa [#allocation30], 1 }
 0x91c   :  { %1922 = vsyncpa [#allocation33], 1 }
 0x91d   :  { %1923 = vsyncpa [#allocation4], 1 }

</bundles_post_ra>
